<compile_context>
chip_gen: v6e
topology: v6e:2x2x1
jax: 0.10.0
libtpu: 0.0.40
codegen_flags: <defaults>
</compile_context>

<pallas_src>
import functools

import jax
import jax.numpy as jnp
from jax.experimental import pallas as pl
from jax.experimental.pallas import tpu as pltpu


def _gru_policy_kernel(x_ref, h0_ref, wih_ref, whh_ref, bcomb_ref, bhn_ref,
                       wp_ref, bp_ref,
                       logits_ref, hout_ref,
                       gi_scr, hs_scr,
                       *, seq_len, chunk, batch_pad, hidden_pad, unroll):
    Hp = hidden_pad
    B = batch_pad
    c = pl.program_id(0)

    # ---- chunk 0: initialize the resident hidden-state carrier from h0. ----
    @pl.when(c == 0)
    def _():
        hout_ref[...] = h0_ref[...]

    # ---- Phase 0: input projection for this chunk (MXU, f32 accumulate). ----
    # gi = x_chunk @ W_ih^T + (b_ih + [b_hh_r, b_hh_z, 0])   -> (Ts*B, 3*Hp)
    gi_scr[...] = (
        jnp.dot(x_ref[...], wih_ref[...], preferred_element_type=jnp.float32)
        + bcomb_ref[...]
    )

    whh = whh_ref[...]            # (Hp, 3*Hp), loop-invariant, MXU dtype
    bhn = bhn_ref[...]            # (1, Hp), f32
    mxu_dtype = whh.dtype
    needs_mask = (seq_len % chunk) != 0   # trace-time Python bool

    # ---- Phase 1: serial recurrence within the chunk; h carried as a value. ----
    def step(t, h_prev):
        off = pl.multiple_of(t * B, B)                  # sublane-aligned slab start
        gi = gi_scr[pl.ds(off, B), :]                   # (B, 3*Hp) f32
        gh = jnp.dot(h_prev.astype(mxu_dtype), whh,
                     preferred_element_type=jnp.float32)  # (B, 3*Hp) f32

        # Gate slices are whole-vreg (128-lane) aligned thanks to Hp padding.
        r = jax.nn.sigmoid(gi[:, :Hp] + gh[:, :Hp])
        z = jax.nn.sigmoid(gi[:, Hp:2 * Hp] + gh[:, Hp:2 * Hp])
        n = jnp.tanh(gi[:, 2 * Hp:] + r * (gh[:, 2 * Hp:] + bhn))
        h_new = (1.0 - z) * n + z * h_prev              # (B, Hp) f32

        if needs_mask:
            valid = (c * chunk + t) < seq_len           # scalar predicate
            h_new = jnp.where(valid, h_new, h_prev)

        hs_scr[pl.ds(off, B), :] = h_new
        return h_new

    h_final = jax.lax.fori_loop(0, chunk, step, hout_ref[...], unroll=unroll)
    hout_ref[...] = h_final

    # ---- Phase 2: ReLU + policy head for the whole chunk (lane-dense output). ----
    a = jnp.maximum(hs_scr[...], 0.0).astype(mxu_dtype)       # (Ts*B, Hp)
    logits_ref[...] = (
        jnp.dot(a, wp_ref[...], preferred_element_type=jnp.float32) + bp_ref[...]
    ).astype(logits_ref.dtype)


def gru_policy_forward(x, h, params, *, time_chunk=None, mxu_dtype=jnp.bfloat16):
    """Pallas forward for GRUPolicy.

    x: (S, B, I) float32, h: (1, B, H) float32.
    Returns (logits, val, h_out): logits = policy(relu(gru_out)).squeeze(0),
    val = zeros((max(1,B), 1)), h_out = (1, B, H).
    """
    S, B, I = x.shape
    H = params["w_hh"].shape[1]
    O = params["w_p"].shape[1]

    B_pad = max(8, ((B + 7) // 8) * 8)          # sublane-aligned batch
    H_pad = max(128, ((H + 127) // 128) * 128)  # lane-aligned per-gate hidden
    O_pad = max(128, ((O + 127) // 128) * 128)  # lane-dense logits

    itm = jnp.dtype(mxu_dtype).itemsize

    # Time-chunk selection: biggest chunk whose streamed buffers stay well under
    # the v7x (64 MiB physical / 32 MiB scoped) VMEM budget.
    if time_chunk is None:
        per_step_bytes = B_pad * (2 * I * itm + 3 * H_pad * 4 + H_pad * 4
                                  + 2 * O_pad * 4)
        time_chunk = max(1, min(S, (8 << 20) // max(per_step_bytes, 1)))
    Ts = max(1, min(time_chunk, S))
    n_chunks = -(-S // Ts)
    S_pad = n_chunks * Ts

    # ---- One-time weight/bias prep (outside the kernel / hot path). ----
    w_ih = params["w_ih"]                       # (3H, I), gate order [r, z, n]
    w_hh = params["w_hh"]                       # (3H, H)
    b_ih, b_hh = params["b_ih"], params["b_hh"]
    w_ih_g = w_ih.reshape(3, H, I)
    w_hh_g = w_hh.reshape(3, H, H)

    # Gate-padded, pre-transposed weights: gate g occupies cols [g*H_pad, g*H_pad+H).
    wih_t = jnp.zeros((I, 3 * H_pad), mxu_dtype)
    whh_t = jnp.zeros((H_pad, 3 * H_pad), mxu_dtype)
    for g in range(3):
        wih_t = wih_t.at[:, g * H_pad:g * H_pad + H].set(w_ih_g[g].T.astype(mxu_dtype))
        whh_t = whh_t.at[:H, g * H_pad:g * H_pad + H].set(w_hh_g[g].T.astype(mxu_dtype))

    # Fold b_ih and the r/z parts of b_hh into the input projection; only b_hh_n
    # stays on the recurrent path (it is multiplied by r).
    b_comb_g = (b_ih + jnp.concatenate(
        [b_hh[:2 * H], jnp.zeros((H,), b_hh.dtype)])).reshape(3, H)
    b_comb = jnp.zeros((1, 3 * H_pad), jnp.float32)
    for g in range(3):
        b_comb = b_comb.at[0, g * H_pad:g * H_pad + H].set(b_comb_g[g])
    b_hn = jnp.zeros((1, H_pad), jnp.float32).at[0, :H].set(b_hh[2 * H:])

    wp_pad = jnp.zeros((H_pad, O_pad), mxu_dtype).at[:H, :O].set(
        params["w_p"].astype(mxu_dtype))
    bp_pad = jnp.zeros((1, O_pad), jnp.float32).at[0, :O].set(params["b_p"])

    # Pad inputs (padded batch rows / time steps / hidden lanes are benign & discarded).
    x_p = jnp.zeros((S_pad, B_pad, I), mxu_dtype).at[:S, :B, :].set(
        x.astype(mxu_dtype))
    x2d = x_p.reshape(S_pad * B_pad, I)
    h_p = jnp.zeros((B_pad, H_pad), jnp.float32).at[:B, :H].set(h[0])

    # Explicit VMEM budget (v5e scoped default is only 16 MiB).
    vmem_needed = (
        2 * Ts * B_pad * I * itm                # x chunk, double-buffered
        + 2 * Ts * B_pad * O_pad * 4            # logits chunk, double-buffered
        + 4 * B_pad * H_pad * 4                 # h0 in + hidden carrier out
        + 2 * (I + H_pad) * 3 * H_pad * itm     # W_ih^T, W_hh^T
        + 2 * H_pad * O_pad * itm               # W_p
        + 2 * (3 * H_pad + H_pad + O_pad) * 4   # biases
        + Ts * B_pad * (3 * H_pad + H_pad) * 4  # gi + hs scratch
    )
    vmem_limit = int(min(max(2 * vmem_needed, 8 << 20), 48 << 20))

    kernel = functools.partial(_gru_policy_kernel,
                               seq_len=S, chunk=Ts, batch_pad=B_pad,
                               hidden_pad=H_pad, unroll=min(4, Ts))

    logits2d, h_out_p = pl.pallas_call(
        kernel,
        out_shape=(
            jax.ShapeDtypeStruct((S_pad * B_pad, O_pad), jnp.float32),
            jax.ShapeDtypeStruct((B_pad, H_pad), jnp.float32),
        ),
        grid_spec=pltpu.PrefetchScalarGridSpec(
            num_scalar_prefetch=0,
            grid=(n_chunks,),
            in_specs=[
                pl.BlockSpec((Ts * B_pad, I), lambda i: (i, 0)),       # x chunk (streamed)
                pl.BlockSpec((B_pad, H_pad), lambda i: (0, 0)),        # h0
                pl.BlockSpec((I, 3 * H_pad), lambda i: (0, 0)),        # W_ih^T
                pl.BlockSpec((H_pad, 3 * H_pad), lambda i: (0, 0)),    # W_hh^T
                pl.BlockSpec((1, 3 * H_pad), lambda i: (0, 0)),        # folded bias
                pl.BlockSpec((1, H_pad), lambda i: (0, 0)),            # b_hh_n
                pl.BlockSpec((H_pad, O_pad), lambda i: (0, 0)),        # W_policy
                pl.BlockSpec((1, O_pad), lambda i: (0, 0)),            # b_policy
            ],
            out_specs=[
                pl.BlockSpec((Ts * B_pad, O_pad), lambda i: (i, 0)),   # logits chunk
                pl.BlockSpec((B_pad, H_pad), lambda i: (0, 0)),        # hidden carrier
            ],
            scratch_shapes=[
                pltpu.VMEM((Ts * B_pad, 3 * H_pad), jnp.float32),      # gi for the chunk
                pltpu.VMEM((Ts * B_pad, H_pad), jnp.float32),          # h_t for the chunk
            ],
        ),
        compiler_params=pltpu.CompilerParams(
            dimension_semantics=("arbitrary",),      # h carried across chunks (serial)
            vmem_limit_bytes=vmem_limit,
        ),
    )(x2d, h_p, wih_t, whh_t, b_comb, b_hn, wp_pad, bp_pad)

    logits = logits2d.reshape(S_pad, B_pad, O_pad)[:S, :B, :O]
    h_out = h_out_p[:B, :H][None]
    # .squeeze(0) as in the PyTorch module (only squeezes when S == 1).
    logits = jnp.squeeze(logits, axis=0) if S == 1 else logits
    val = jnp.zeros((max(1, B), 1), dtype=jnp.float32)   # self.val from init_hidden_state
    # TODO(synk): torch.distributions.Categorical has no Pallas equivalent; the raw
    #             logits are returned (log-softmax / sampling is host-side glue).
    return logits, val, h_out


def _reference_forward(x, h, params):
    """Pure-JAX reference matching torch.nn.GRU gate equations."""
    S, B, I = x.shape
    H = params["w_hh"].shape[1]
    w_ih, w_hh = params["w_ih"], params["w_hh"]
    b_ih, b_hh = params["b_ih"], params["b_hh"]

    def step(h_prev, x_t):
        gi = x_t @ w_ih.T + b_ih
        gh = h_prev @ w_hh.T + b_hh
        i_r, i_z, i_n = gi[:, :H], gi[:, H:2 * H], gi[:, 2 * H:]
        h_r, h_z, h_n = gh[:, :H], gh[:, H:2 * H], gh[:, 2 * H:]
        r = jax.nn.sigmoid(i_r + h_r)
        z = jax.nn.sigmoid(i_z + h_z)
        n = jnp.tanh(i_n + r * h_n)
        h_new = (1.0 - z) * n + z * h_prev
        return h_new, h_new

    h_last, outs = jax.lax.scan(step, h[0], x)
    a = jnp.maximum(outs, 0.0)
    logits = a @ params["w_p"] + params["b_p"]
    return logits, h_last[None]


def make_params(key, input_size, hidden_size, output_size):
    ks = jax.random.split(key, 6)
    scale = 0.1
    return {
        "w_ih": scale * jax.random.normal(ks[0], (3 * hidden_size, input_size), jnp.float32),
        "w_hh": scale * jax.random.normal(ks[1], (3 * hidden_size, hidden_size), jnp.float32),
        "b_ih": scale * jax.random.normal(ks[2], (3 * hidden_size,), jnp.float32),
        "b_hh": scale * jax.random.normal(ks[3], (3 * hidden_size,), jnp.float32),
        # policy Linear stored transposed as (H, O) for direct a @ W_p
        "w_p": scale * jax.random.normal(ks[4], (hidden_size, output_size), jnp.float32),
        "b_p": scale * jax.random.normal(ks[5], (output_size,), jnp.float32),
    }


if __name__ == "__main__":
    SEQ, BATCH, INPUT, HIDDEN, OUT = 8, 2, 16, 32, 4

    key = jax.random.PRNGKey(0)
    kx, kp = jax.random.split(key)
    x = jax.random.normal(kx, (SEQ, BATCH, INPUT), jnp.float32)
    h0 = jnp.zeros((1, BATCH, HIDDEN), jnp.float32)
    params = make_params(kp, INPUT, HIDDEN, OUT)

    ref_logits, ref_h = _reference_forward(x, h0, params)

    # f32 MXU path: tight validation against the pure-JAX reference (even chunks).
    logits, val, h_out = gru_policy_forward(x, h0, params,
                                            time_chunk=4, mxu_dtype=jnp.float32)
    jax.block_until_ready((logits, val, h_out))
    assert jnp.allclose(logits, ref_logits, atol=1e-4, rtol=1e-4), "logits mismatch (f32)"
    assert jnp.allclose(h_out, ref_h, atol=1e-4, rtol=1e-4), "hidden mismatch (f32)"
    assert val.shape == (BATCH, 1)

    # bf16 MXU path (production default), odd chunk size to exercise remainder masking.
    logits_bf, _, h_out_bf = gru_policy_forward(x, h0, params,
                                                time_chunk=3, mxu_dtype=jnp.bfloat16)
    jax.block_until_ready((logits_bf, h_out_bf))
    assert jnp.allclose(logits_bf, ref_logits, atol=5e-2, rtol=5e-2), "logits mismatch (bf16)"
    assert jnp.allclose(h_out_bf, ref_h, atol=5e-2, rtol=5e-2), "hidden mismatch (bf16)"

    print("KERNEL_OK")
</pallas_src>

<mosaic_0001>
module attributes {stable_mosaic.version = 11 : i64} {
  func.func @_gru_policy_kernel(%arg0: i32, %arg1: memref<32x16xf32, #tpu.memory_space<vmem>>, %arg2: memref<8x128xf32, #tpu.memory_space<vmem>>, %arg3: memref<16x384xf32, #tpu.memory_space<vmem>>, %arg4: memref<128x384xf32, #tpu.memory_space<vmem>>, %arg5: memref<1x384xf32, #tpu.memory_space<vmem>>, %arg6: memref<1x128xf32, #tpu.memory_space<vmem>>, %arg7: memref<128x128xf32, #tpu.memory_space<vmem>>, %arg8: memref<1x128xf32, #tpu.memory_space<vmem>>, %arg9: memref<32x128xf32, #tpu.memory_space<vmem>>, %arg10: memref<8x128xf32, #tpu.memory_space<vmem>>, %arg11: memref<32x384xf32, #tpu.memory_space<vmem>>, %arg12: memref<32x128xf32, #tpu.memory_space<vmem>>) attributes {dimension_semantics = [#tpu.dimension_semantics<arbitrary>], iteration_bounds = array<i64: 2>, scalar_prefetch = 0 : i64, scratch_operands = 2 : i64, tpu.core_type = #tpu.core_type<tc>, window_params = [{transform_indices = @transform_0, window_bounds = array<i64: 32, 16>}, {pipeline_mode = #tpu.pipeline_mode<synchronous>, transform_indices = @transform_1, window_bounds = array<i64: 8, 128>}, {pipeline_mode = #tpu.pipeline_mode<synchronous>, transform_indices = @transform_2, window_bounds = array<i64: 16, 384>}, {pipeline_mode = #tpu.pipeline_mode<synchronous>, transform_indices = @transform_3, window_bounds = array<i64: 128, 384>}, {pipeline_mode = #tpu.pipeline_mode<synchronous>, transform_indices = @transform_4, window_bounds = array<i64: 1, 384>}, {pipeline_mode = #tpu.pipeline_mode<synchronous>, transform_indices = @transform_5, window_bounds = array<i64: 1, 128>}, {pipeline_mode = #tpu.pipeline_mode<synchronous>, transform_indices = @transform_6, window_bounds = array<i64: 128, 128>}, {pipeline_mode = #tpu.pipeline_mode<synchronous>, transform_indices = @transform_7, window_bounds = array<i64: 1, 128>}, {transform_indices = @transform_8, window_bounds = array<i64: 32, 128>}, {pipeline_mode = #tpu.pipeline_mode<synchronous>, transform_indices = @transform_9, window_bounds = array<i64: 8, 128>}]} {
    %c0_i32 = arith.constant 0 : i32
    %0 = arith.cmpi eq, %arg0, %c0_i32 : i32
    %1 = arith.extui %0 : i1 to i32
    %c0_i32_0 = arith.constant 0 : i32
    %2 = arith.cmpi ne, %1, %c0_i32_0 : i32
    scf.if %2 {
      %c0_54 = arith.constant 0 : index
      %c0_55 = arith.constant 0 : index
      %163 = vector.load %arg2[%c0_54, %c0_55] : memref<8x128xf32, #tpu.memory_space<vmem>>, vector<8x128xf32>
      %c0_56 = arith.constant 0 : index
      %c0_57 = arith.constant 0 : index
      %164 = vector.load %arg10[%c0_56, %c0_57] : memref<8x128xf32, #tpu.memory_space<vmem>>, vector<8x128xf32>
      tpu.vector_store %arg10[%c0_56, %c0_57], %163 {strides = array<i32>} : memref<8x128xf32, #tpu.memory_space<vmem>>, vector<8x128xf32>,
    } else {
    }
    %c0 = arith.constant 0 : index
    %c0_1 = arith.constant 0 : index
    %3 = vector.load %arg1[%c0, %c0_1] : memref<32x16xf32, #tpu.memory_space<vmem>>, vector<32x16xf32>
    %c0_2 = arith.constant 0 : index
    %c0_3 = arith.constant 0 : index
    %4 = vector.load %arg3[%c0_2, %c0_3] : memref<16x384xf32, #tpu.memory_space<vmem>>, vector<16x384xf32>
    %cst = arith.constant dense<0.000000e+00> : vector<32x384xf32>
    %5 = tpu.matmul %3, %4, %cst {dimension_numbers = #tpu.dot_dimension_numbers<[1], [0], [0], [1], [0, 0, 1, 1], [], []>} : vector<32x16xf32>, vector<16x384xf32>, vector<32x384xf32> -> vector<32x384xf32>
    %c0_4 = arith.constant 0 : index
    %c0_5 = arith.constant 0 : index
    %6 = vector.load %arg5[%c0_4, %c0_5] : memref<1x384xf32, #tpu.memory_space<vmem>>, vector<1x384xf32>
    %7 = vector.broadcast %6 : vector<1x384xf32> to vector<32x384xf32>
    %8 = arith.addf %5, %7 : vector<32x384xf32>
    %c0_6 = arith.constant 0 : index
    %c0_7 = arith.constant 0 : index
    %9 = vector.load %arg11[%c0_6, %c0_7] : memref<32x384xf32, #tpu.memory_space<vmem>>, vector<32x384xf32>
    tpu.vector_store %arg11[%c0_6, %c0_7], %8 {strides = array<i32>} : memref<32x384xf32, #tpu.memory_space<vmem>>, vector<32x384xf32>,
    %c0_8 = arith.constant 0 : index
    %c0_9 = arith.constant 0 : index
    %10 = vector.load %arg4[%c0_8, %c0_9] : memref<128x384xf32, #tpu.memory_space<vmem>>, vector<128x384xf32>
    %c0_10 = arith.constant 0 : index
    %c0_11 = arith.constant 0 : index
    %11 = vector.load %arg6[%c0_10, %c0_11] : memref<1x128xf32, #tpu.memory_space<vmem>>, vector<1x128xf32>
    %c0_12 = arith.constant 0 : index
    %c0_13 = arith.constant 0 : index
    %12 = vector.load %arg10[%c0_12, %c0_13] : memref<8x128xf32, #tpu.memory_space<vmem>>, vector<8x128xf32>
    %c0_i32_14 = arith.constant 0 : i32
    %c8_i32 = arith.constant 8 : i32
    %13 = arith.muli %c0_i32_14, %c8_i32 : i32
    %14 = tpu.assume_multiple %13, 8 : i32
    %15 = arith.index_cast %14 : i32 to index
    %c0_15 = arith.constant 0 : index
    %16 = vector.load %arg11[%15, %c0_15] : memref<32x384xf32, #tpu.memory_space<vmem>>, vector<8x384xf32>
    %cst_16 = arith.constant dense<0.000000e+00> : vector<8x384xf32>
    %17 = tpu.matmul %12, %10, %cst_16 {dimension_numbers = #tpu.dot_dimension_numbers<[1], [0], [0], [1], [0, 0, 1, 1], [], []>} : vector<8x128xf32>, vector<128x384xf32>, vector<8x384xf32> -> vector<8x384xf32>
    %18 = vector.extract_strided_slice %16 {offsets = [0, 0], sizes = [8, 128], strides = [1, 1]} : vector<8x384xf32> to vector<8x128xf32>
    %19 = vector.extract_strided_slice %17 {offsets = [0, 0], sizes = [8, 128], strides = [1, 1]} : vector<8x384xf32> to vector<8x128xf32>
    %20 = arith.addf %18, %19 : vector<8x128xf32>
    %21 = arith.negf %20 : vector<8x128xf32>
    %22 = math.exp %21 : vector<8x128xf32>
    %cst_17 = arith.constant 1.000000e+00 : f32
    %23 = vector.broadcast %cst_17 : f32 to vector<8x128xf32>
    %24 = arith.addf %23, %22 : vector<8x128xf32>
    %25 = arith.divf %23, %24 : vector<8x128xf32>
    %26 = vector.extract_strided_slice %16 {offsets = [0, 128], sizes = [8, 128], strides = [1, 1]} : vector<8x384xf32> to vector<8x128xf32>
    %27 = vector.extract_strided_slice %17 {offsets = [0, 128], sizes = [8, 128], strides = [1, 1]} : vector<8x384xf32> to vector<8x128xf32>
    %28 = arith.addf %26, %27 : vector<8x128xf32>
    %29 = arith.negf %28 : vector<8x128xf32>
    %30 = math.exp %29 : vector<8x128xf32>
    %cst_18 = arith.constant 1.000000e+00 : f32
    %31 = vector.broadcast %cst_18 : f32 to vector<8x128xf32>
    %32 = arith.addf %31, %30 : vector<8x128xf32>
    %33 = arith.divf %31, %32 : vector<8x128xf32>
    %34 = vector.extract_strided_slice %16 {offsets = [0, 256], sizes = [8, 128], strides = [1, 1]} : vector<8x384xf32> to vector<8x128xf32>
    %35 = vector.extract_strided_slice %17 {offsets = [0, 256], sizes = [8, 128], strides = [1, 1]} : vector<8x384xf32> to vector<8x128xf32>
    %36 = vector.broadcast %11 : vector<1x128xf32> to vector<8x128xf32>
    %37 = arith.addf %35, %36 : vector<8x128xf32>
    %38 = arith.mulf %25, %37 : vector<8x128xf32>
    %39 = arith.addf %34, %38 : vector<8x128xf32>
    %40 = math.tanh %39 : vector<8x128xf32>
    %cst_19 = arith.constant 1.000000e+00 : f32
    %41 = vector.broadcast %cst_19 : f32 to vector<8x128xf32>
    %42 = arith.subf %41, %33 : vector<8x128xf32>
    %43 = arith.mulf %42, %40 : vector<8x128xf32>
    %44 = arith.mulf %33, %12 : vector<8x128xf32>
    %45 = arith.addf %43, %44 : vector<8x128xf32>
    %46 = arith.index_cast %14 : i32 to index
    %c0_20 = arith.constant 0 : index
    %47 = vector.load %arg12[%46, %c0_20] : memref<32x128xf32, #tpu.memory_space<vmem>>, vector<8x128xf32>
    tpu.vector_store %arg12[%46, %c0_20], %45 {strides = array<i32>} : memref<32x128xf32, #tpu.memory_space<vmem>>, vector<8x128xf32>,
    %c1_i32 = arith.constant 1 : i32
    %c8_i32_21 = arith.constant 8 : i32
    %48 = arith.muli %c1_i32, %c8_i32_21 : i32
    %49 = tpu.assume_multiple %48, 8 : i32
    %50 = arith.index_cast %49 : i32 to index
    %c0_22 = arith.constant 0 : index
    %51 = vector.load %arg11[%50, %c0_22] : memref<32x384xf32, #tpu.memory_space<vmem>>, vector<8x384xf32>
    %cst_23 = arith.constant dense<0.000000e+00> : vector<8x384xf32>
    %52 = tpu.matmul %45, %10, %cst_23 {dimension_numbers = #tpu.dot_dimension_numbers<[1], [0], [0], [1], [0, 0, 1, 1], [], []>} : vector<8x128xf32>, vector<128x384xf32>, vector<8x384xf32> -> vector<8x384xf32>
    %53 = vector.extract_strided_slice %51 {offsets = [0, 0], sizes = [8, 128], strides = [1, 1]} : vector<8x384xf32> to vector<8x128xf32>
    %54 = vector.extract_strided_slice %52 {offsets = [0, 0], sizes = [8, 128], strides = [1, 1]} : vector<8x384xf32> to vector<8x128xf32>
    %55 = arith.addf %53, %54 : vector<8x128xf32>
    %56 = arith.negf %55 : vector<8x128xf32>
    %57 = math.exp %56 : vector<8x128xf32>
    %cst_24 = arith.constant 1.000000e+00 : f32
    %58 = vector.broadcast %cst_24 : f32 to vector<8x128xf32>
    %59 = arith.addf %58, %57 : vector<8x128xf32>
    %60 = arith.divf %58, %59 : vector<8x128xf32>
    %61 = vector.extract_strided_slice %51 {offsets = [0, 128], sizes = [8, 128], strides = [1, 1]} : vector<8x384xf32> to vector<8x128xf32>
    %62 = vector.extract_strided_slice %52 {offsets = [0, 128], sizes = [8, 128], strides = [1, 1]} : vector<8x384xf32> to vector<8x128xf32>
    %63 = arith.addf %61, %62 : vector<8x128xf32>
    %64 = arith.negf %63 : vector<8x128xf32>
    %65 = math.exp %64 : vector<8x128xf32>
    %cst_25 = arith.constant 1.000000e+00 : f32
    %66 = vector.broadcast %cst_25 : f32 to vector<8x128xf32>
    %67 = arith.addf %66, %65 : vector<8x128xf32>
    %68 = arith.divf %66, %67 : vector<8x128xf32>
    %69 = vector.extract_strided_slice %51 {offsets = [0, 256], sizes = [8, 128], strides = [1, 1]} : vector<8x384xf32> to vector<8x128xf32>
    %70 = vector.extract_strided_slice %52 {offsets = [0, 256], sizes = [8, 128], strides = [1, 1]} : vector<8x384xf32> to vector<8x128xf32>
    %71 = vector.broadcast %11 : vector<1x128xf32> to vector<8x128xf32>
    %72 = arith.addf %70, %71 : vector<8x128xf32>
    %73 = arith.mulf %60, %72 : vector<8x128xf32>
    %74 = arith.addf %69, %73 : vector<8x128xf32>
    %75 = math.tanh %74 : vector<8x128xf32>
    %cst_26 = arith.constant 1.000000e+00 : f32
    %76 = vector.broadcast %cst_26 : f32 to vector<8x128xf32>
    %77 = arith.subf %76, %68 : vector<8x128xf32>
    %78 = arith.mulf %77, %75 : vector<8x128xf32>
    %79 = arith.mulf %68, %45 : vector<8x128xf32>
    %80 = arith.addf %78, %79 : vector<8x128xf32>
    %81 = arith.index_cast %49 : i32 to index
    %c0_27 = arith.constant 0 : index
    %82 = vector.load %arg12[%81, %c0_27] : memref<32x128xf32, #tpu.memory_space<vmem>>, vector<8x128xf32>
    tpu.vector_store %arg12[%81, %c0_27], %80 {strides = array<i32>} : memref<32x128xf32, #tpu.memory_space<vmem>>, vector<8x128xf32>,
    %c2_i32 = arith.constant 2 : i32
    %c8_i32_28 = arith.constant 8 : i32
    %83 = arith.muli %c2_i32, %c8_i32_28 : i32
    %84 = tpu.assume_multiple %83, 8 : i32
    %85 = arith.index_cast %84 : i32 to index
    %c0_29 = arith.constant 0 : index
    %86 = vector.load %arg11[%85, %c0_29] : memref<32x384xf32, #tpu.memory_space<vmem>>, vector<8x384xf32>
    %cst_30 = arith.constant dense<0.000000e+00> : vector<8x384xf32>
    %87 = tpu.matmul %80, %10, %cst_30 {dimension_numbers = #tpu.dot_dimension_numbers<[1], [0], [0], [1], [0, 0, 1, 1], [], []>} : vector<8x128xf32>, vector<128x384xf32>, vector<8x384xf32> -> vector<8x384xf32>
    %88 = vector.extract_strided_slice %86 {offsets = [0, 0], sizes = [8, 128], strides = [1, 1]} : vector<8x384xf32> to vector<8x128xf32>
    %89 = vector.extract_strided_slice %87 {offsets = [0, 0], sizes = [8, 128], strides = [1, 1]} : vector<8x384xf32> to vector<8x128xf32>
    %90 = arith.addf %88, %89 : vector<8x128xf32>
    %91 = arith.negf %90 : vector<8x128xf32>
    %92 = math.exp %91 : vector<8x128xf32>
    %cst_31 = arith.constant 1.000000e+00 : f32
    %93 = vector.broadcast %cst_31 : f32 to vector<8x128xf32>
    %94 = arith.addf %93, %92 : vector<8x128xf32>
    %95 = arith.divf %93, %94 : vector<8x128xf32>
    %96 = vector.extract_strided_slice %86 {offsets = [0, 128], sizes = [8, 128], strides = [1, 1]} : vector<8x384xf32> to vector<8x128xf32>
    %97 = vector.extract_strided_slice %87 {offsets = [0, 128], sizes = [8, 128], strides = [1, 1]} : vector<8x384xf32> to vector<8x128xf32>
    %98 = arith.addf %96, %97 : vector<8x128xf32>
    %99 = arith.negf %98 : vector<8x128xf32>
    %100 = math.exp %99 : vector<8x128xf32>
    %cst_32 = arith.constant 1.000000e+00 : f32
    %101 = vector.broadcast %cst_32 : f32 to vector<8x128xf32>
    %102 = arith.addf %101, %100 : vector<8x128xf32>
    %103 = arith.divf %101, %102 : vector<8x128xf32>
    %104 = vector.extract_strided_slice %86 {offsets = [0, 256], sizes = [8, 128], strides = [1, 1]} : vector<8x384xf32> to vector<8x128xf32>
    %105 = vector.extract_strided_slice %87 {offsets = [0, 256], sizes = [8, 128], strides = [1, 1]} : vector<8x384xf32> to vector<8x128xf32>
    %106 = vector.broadcast %11 : vector<1x128xf32> to vector<8x128xf32>
    %107 = arith.addf %105, %106 : vector<8x128xf32>
    %108 = arith.mulf %95, %107 : vector<8x128xf32>
    %109 = arith.addf %104, %108 : vector<8x128xf32>
    %110 = math.tanh %109 : vector<8x128xf32>
    %cst_33 = arith.constant 1.000000e+00 : f32
    %111 = vector.broadcast %cst_33 : f32 to vector<8x128xf32>
    %112 = arith.subf %111, %103 : vector<8x128xf32>
    %113 = arith.mulf %112, %110 : vector<8x128xf32>
    %114 = arith.mulf %103, %80 : vector<8x128xf32>
    %115 = arith.addf %113, %114 : vector<8x128xf32>
    %116 = arith.index_cast %84 : i32 to index
    %c0_34 = arith.constant 0 : index
    %117 = vector.load %arg12[%116, %c0_34] : memref<32x128xf32, #tpu.memory_space<vmem>>, vector<8x128xf32>
    tpu.vector_store %arg12[%116, %c0_34], %115 {strides = array<i32>} : memref<32x128xf32, #tpu.memory_space<vmem>>, vector<8x128xf32>,
    %c3_i32 = arith.constant 3 : i32
    %c8_i32_35 = arith.constant 8 : i32
    %118 = arith.muli %c3_i32, %c8_i32_35 : i32
    %119 = tpu.assume_multiple %118, 8 : i32
    %120 = arith.index_cast %119 : i32 to index
    %c0_36 = arith.constant 0 : index
    %121 = vector.load %arg11[%120, %c0_36] : memref<32x384xf32, #tpu.memory_space<vmem>>, vector<8x384xf32>
    %cst_37 = arith.constant dense<0.000000e+00> : vector<8x384xf32>
    %122 = tpu.matmul %115, %10, %cst_37 {dimension_numbers = #tpu.dot_dimension_numbers<[1], [0], [0], [1], [0, 0, 1, 1], [], []>} : vector<8x128xf32>, vector<128x384xf32>, vector<8x384xf32> -> vector<8x384xf32>
    %123 = vector.extract_strided_slice %121 {offsets = [0, 0], sizes = [8, 128], strides = [1, 1]} : vector<8x384xf32> to vector<8x128xf32>
    %124 = vector.extract_strided_slice %122 {offsets = [0, 0], sizes = [8, 128], strides = [1, 1]} : vector<8x384xf32> to vector<8x128xf32>
    %125 = arith.addf %123, %124 : vector<8x128xf32>
    %126 = arith.negf %125 : vector<8x128xf32>
    %127 = math.exp %126 : vector<8x128xf32>
    %cst_38 = arith.constant 1.000000e+00 : f32
    %128 = vector.broadcast %cst_38 : f32 to vector<8x128xf32>
    %129 = arith.addf %128, %127 : vector<8x128xf32>
    %130 = arith.divf %128, %129 : vector<8x128xf32>
    %131 = vector.extract_strided_slice %121 {offsets = [0, 128], sizes = [8, 128], strides = [1, 1]} : vector<8x384xf32> to vector<8x128xf32>
    %132 = vector.extract_strided_slice %122 {offsets = [0, 128], sizes = [8, 128], strides = [1, 1]} : vector<8x384xf32> to vector<8x128xf32>
    %133 = arith.addf %131, %132 : vector<8x128xf32>
    %134 = arith.negf %133 : vector<8x128xf32>
    %135 = math.exp %134 : vector<8x128xf32>
    %cst_39 = arith.constant 1.000000e+00 : f32
    %136 = vector.broadcast %cst_39 : f32 to vector<8x128xf32>
    %137 = arith.addf %136, %135 : vector<8x128xf32>
    %138 = arith.divf %136, %137 : vector<8x128xf32>
    %139 = vector.extract_strided_slice %121 {offsets = [0, 256], sizes = [8, 128], strides = [1, 1]} : vector<8x384xf32> to vector<8x128xf32>
    %140 = vector.extract_strided_slice %122 {offsets = [0, 256], sizes = [8, 128], strides = [1, 1]} : vector<8x384xf32> to vector<8x128xf32>
    %141 = vector.broadcast %11 : vector<1x128xf32> to vector<8x128xf32>
    %142 = arith.addf %140, %141 : vector<8x128xf32>
    %143 = arith.mulf %130, %142 : vector<8x128xf32>
    %144 = arith.addf %139, %143 : vector<8x128xf32>
    %145 = math.tanh %144 : vector<8x128xf32>
    %cst_40 = arith.constant 1.000000e+00 : f32
    %146 = vector.broadcast %cst_40 : f32 to vector<8x128xf32>
    %147 = arith.subf %146, %138 : vector<8x128xf32>
    %148 = arith.mulf %147, %145 : vector<8x128xf32>
    %149 = arith.mulf %138, %115 : vector<8x128xf32>
    %150 = arith.addf %148, %149 : vector<8x128xf32>
    %151 = arith.index_cast %119 : i32 to index
    %c0_41 = arith.constant 0 : index
    %152 = vector.load %arg12[%151, %c0_41] : memref<32x128xf32, #tpu.memory_space<vmem>>, vector<8x128xf32>
    tpu.vector_store %arg12[%151, %c0_41], %150 {strides = array<i32>} : memref<32x128xf32, #tpu.memory_space<vmem>>, vector<8x128xf32>,
    %c4_i32 = arith.constant 4 : i32
    %c0_42 = arith.constant 0 : index
    %c0_43 = arith.constant 0 : index
    %153 = vector.load %arg10[%c0_42, %c0_43] : memref<8x128xf32, #tpu.memory_space<vmem>>, vector<8x128xf32>
    tpu.vector_store %arg10[%c0_42, %c0_43], %150 {strides = array<i32>} : memref<8x128xf32, #tpu.memory_space<vmem>>, vector<8x128xf32>,
    %c0_44 = arith.constant 0 : index
    %c0_45 = arith.constant 0 : index
    %154 = vector.load %arg12[%c0_44, %c0_45] : memref<32x128xf32, #tpu.memory_space<vmem>>, vector<32x128xf32>
    %cst_46 = arith.constant 0.000000e+00 : f32
    %155 = vector.broadcast %cst_46 : f32 to vector<32x128xf32>
    %156 = arith.maximumf %154, %155 : vector<32x128xf32>
    %c0_47 = arith.constant 0 : index
    %c0_48 = arith.constant 0 : index
    %157 = vector.load %arg7[%c0_47, %c0_48] : memref<128x128xf32, #tpu.memory_space<vmem>>, vector<128x128xf32>
    %cst_49 = arith.constant dense<0.000000e+00> : vector<32x128xf32>
    %158 = tpu.matmul %156, %157, %cst_49 {dimension_numbers = #tpu.dot_dimension_numbers<[1], [0], [0], [1], [0, 0, 1, 1], [], []>} : vector<32x128xf32>, vector<128x128xf32>, vector<32x128xf32> -> vector<32x128xf32>
    %c0_50 = arith.constant 0 : index
    %c0_51 = arith.constant 0 : index
    %159 = vector.load %arg8[%c0_50, %c0_51] : memref<1x128xf32, #tpu.memory_space<vmem>>, vector<1x128xf32>
    %160 = vector.broadcast %159 : vector<1x128xf32> to vector<32x128xf32>
    %161 = arith.addf %158, %160 : vector<32x128xf32>
    %c0_52 = arith.constant 0 : index
    %c0_53 = arith.constant 0 : index
    %162 = vector.load %arg9[%c0_52, %c0_53] : memref<32x128xf32, #tpu.memory_space<vmem>>, vector<32x128xf32>
    tpu.vector_store %arg9[%c0_52, %c0_53], %161 {strides = array<i32>} : memref<32x128xf32, #tpu.memory_space<vmem>>, vector<32x128xf32>,
    return
  }
  func.func @transform_0(%arg0: i32) -> (i32, i32) {
    %c0_i32 = arith.constant 0 : i32
    %c0_i32_0 = arith.constant 0 : i32
    return %arg0, %c0_i32 : i32, i32
  }
  func.func @transform_1(%arg0: i32) -> (i32, i32) {
    %c0_i32 = arith.constant 0 : i32
    %c0_i32_0 = arith.constant 0 : i32
    %c0_i32_1 = arith.constant 0 : i32
    return %c0_i32, %c0_i32_0 : i32, i32
  }
  func.func @transform_2(%arg0: i32) -> (i32, i32) {
    %c0_i32 = arith.constant 0 : i32
    %c0_i32_0 = arith.constant 0 : i32
    %c0_i32_1 = arith.constant 0 : i32
    return %c0_i32, %c0_i32_0 : i32, i32
  }
  func.func @transform_3(%arg0: i32) -> (i32, i32) {
    %c0_i32 = arith.constant 0 : i32
    %c0_i32_0 = arith.constant 0 : i32
    %c0_i32_1 = arith.constant 0 : i32
    return %c0_i32, %c0_i32_0 : i32, i32
  }
  func.func @transform_4(%arg0: i32) -> (i32, i32) {
    %c0_i32 = arith.constant 0 : i32
    %c0_i32_0 = arith.constant 0 : i32
    %c0_i32_1 = arith.constant 0 : i32
    return %c0_i32, %c0_i32_0 : i32, i32
  }
  func.func @transform_5(%arg0: i32) -> (i32, i32) {
    %c0_i32 = arith.constant 0 : i32
    %c0_i32_0 = arith.constant 0 : i32
    %c0_i32_1 = arith.constant 0 : i32
    return %c0_i32, %c0_i32_0 : i32, i32
  }
  func.func @transform_6(%arg0: i32) -> (i32, i32) {
    %c0_i32 = arith.constant 0 : i32
    %c0_i32_0 = arith.constant 0 : i32
    %c0_i32_1 = arith.constant 0 : i32
    return %c0_i32, %c0_i32_0 : i32, i32
  }
  func.func @transform_7(%arg0: i32) -> (i32, i32) {
    %c0_i32 = arith.constant 0 : i32
    %c0_i32_0 = arith.constant 0 : i32
    %c0_i32_1 = arith.constant 0 : i32
    return %c0_i32, %c0_i32_0 : i32, i32
  }
  func.func @transform_8(%arg0: i32) -> (i32, i32) {
    %c0_i32 = arith.constant 0 : i32
    %c0_i32_0 = arith.constant 0 : i32
    return %arg0, %c0_i32 : i32, i32
  }
  func.func @transform_9(%arg0: i32) -> (i32, i32) {
    %c0_i32 = arith.constant 0 : i32
    %c0_i32_0 = arith.constant 0 : i32
    %c0_i32_1 = arith.constant 0 : i32
    return %c0_i32, %c0_i32_0 : i32, i32
  }
}

</mosaic_0001>

<bundles_post_ra>
// kernel: tpu_custom_call.1
= control target key start
LH: loop header
LB: loop body
LE: loop exit
PB: predicated region body
PF: predicated region fallthrough
CT: control target
= control target key end

     0   :  { %15 = vsyncpa [#allocation5], 0  ;;  %s2866_s0 = inlined_call_operand.vmem [shape: f32[64,16], index: 0, kind: input, shape index: {}]   ;;  %s2867_s1 = inlined_call_operand.vmem [shape: f32[8,128], index: 1, kind: input, shape index: {}]   ;;  %s2868_s2 = inlined_call_operand.vmem [shape: f32[16,384], index: 2, kind: input, shape index: {}]   ;;  %s2869_s3 = inlined_call_operand.hbm [shape: f32[128,384], index: 3, kind: input, shape index: {}]   ;;  %s2870_s4 = inlined_call_operand.vmem [shape: f32[1,384], index: 4, kind: input, shape index: {}]   ;;  %s2871_s5 = inlined_call_operand.vmem [shape: f32[1,128], index: 5, kind: input, shape index: {}]   ;;  %s2872_s6 = inlined_call_operand.hbm [shape: f32[128,128], index: 6, kind: input, shape index: {}]   ;;  %s2873_s7 = inlined_call_operand.vmem [shape: f32[1,128], index: 7, kind: input, shape index: {}]   ;;  %s2874_s8 = inlined_call_operand.hbm [shape: f32[64,128], index: 8, kind: output, shape index: {0}]   ;;  %s2875_s9 = inlined_call_operand.hbm [shape: f32[8,128], index: 9, kind: output, shape index: {1}]  }
   0x1   :  { %16 = vsyncpa [#allocation8], 0 }
   0x2   :  { %17 = vsyncpa [#allocation6], 0 }
   0x3   :  { %19 = vsyncpa [#allocation6 + $0x1], 0 }
   0x4   :  { %20 = vsyncpa [#allocation11], 0  ;;  %s2225_s30 = smov 0   ;;  %s2227_s10 = smov 0  }
   0x5   :  { %s2229_s11 = smov 0   ;;  %s2231_s12 = smov 0  }
   0x6 LB: > { %s2246_s13 = sadd.s32 4294967295, %s2161_s12   ;;  %s1578_s14 = sadd.s32 4294967294, %s2161_s12   ;;  %s2161_s12 = sphi %s2231_s12, %s2951_s12   ;;  %s2157_s11 = sphi %s2229_s11, %s2950_s11   ;;  %s2153_s10 = sphi %s2227_s10, %s2949_s10   ;;  %s2149_s30 = sphi %s2225_s30, %s2948_s30  }
   0x7   : > { %s2250_s15 = sadd.s32 1, %s2161_s12   ;;  %s206_s16 = sadd.s32 1, %s2157_s11 }
   0x8   : > { %s203_s17 = ssub.s32 %s2161_s12, %s2250_s15  ;;  %p216_p0 = scmp.ne.s32.totalorder %s2157_s11, %s2153_s10 }
   0x9   : > { %p204_p1 = scmp.eq.s32.totalorder %s203_s17, 0  ;;  %p2876_p2 = scmp.eq.s32.totalorder %s2246_s13, 1 }
   0xa   : > { %p222_p3 = scmp.ne.s32.totalorder %s2153_s10, %s2149_s30  ;;  %p223_p4 = scmp.eq.s32.totalorder %s1578_s14, 1 }
   0xb   : > { %s2261_s18 = scalar_select %p204_p1, %s2157_s11, %s206_s16  }
   0xc   : > { %p2265_p5 = por %p2876_p2, %p216_p0  ;;  %p2269_p6 = por %p223_p4, %p222_p3 }
   0xd   : > { %2895 = sst [smem:[#allocation16_spill]] %s2261_s18  ;;  %p1579_p7 = scmp.ge.s32.totalorder %s2161_s12, 1 }
   0xe   : > { %s2897_s20 = scalar_select %p2269_p6, 1, 0 }
   0xf   : > { %p251_p8 = scmp.lt.s32.totalorder %s2161_s12, 3  ;;  %p2877_p10 = scmp.eq.s32.totalorder %s2246_s13, 0 }
  0x10   : > { %s2163_s22 = smov [#allocation4]   ;;  %s2164_s25 = smov [#allocation7]  }
  0x11   : > { %p2277_p11 = pnand %p1579_p7, %p251_p8  ;;  %s269_s23 = sshll.u32 %s2163_s22, 4  ;;  %s270_s23 = int_to_ptr.vmem [resolvable:$true] %s269_s23 }
  0x12   : > { %s288_s26 = sshll.u32 %s2164_s25, 4  ;;  %s2024_s27 = scalar_lea.vmem %s270_s23, 6144  ;;  %s289_s26 = int_to_ptr.vmem [resolvable:$true] %s288_s26 }
  0x13   : > { %p1912_p12 = pneg %p2277_p11  ;;  %p2025_p1 = scmp.ne.s32.totalorder %s270_s23, %s2024_s27 }
  0x14   : > { %p2032_p7 = scmp.lt.s32.totalorder %s270_s23, %s270_s23  ;;  %p2033_p8 = scmp.lt.s32.totalorder %s2024_s27, %s2024_s27 }
  0x15   : > { %p2285_p13 = pnand %p2877_p10, %p1912_p12 }
  0x16   : > { %p2034_p2 = por %p2033_p8, %p2032_p7 }
  0x17   : > { %p2015_p0 = pneg %p2285_p13 }
  0x19   : > { %p2027_p3 = pnand %p2025_p1, %p2015_p0 }
  0x1b   : > { %p2028_p4 = pneg %p2027_p3 }
  0x1d   : > { %p2035_p12 = pnand %p2034_p2, %p2028_p4 }
  0x1f   : > { %2038 = shalt.err (!%p2035_p12)
}
  0x20   : > { %s2165_s28 = smov 384   ;;  %s2166_s29 = smov 24  }
  0x21   : > { %1915 = dma.hbm_to_vmem [thread:$0]  (!%p2285_p13), %s2869_s3, 6144, %s270_s23, [#allocation5], %s2165_s28, %s2165_s28, %s2166_s29  }
  0x22   : > { %s2050_s17 = scalar_lea.vmem %s289_s26, 2048  ;;  %p2058_p10 = scmp.lt.s32.totalorder %s289_s26, %s289_s26 }
  0x23   : > { %p2051_p9 = scmp.ne.s32.totalorder %s289_s26, %s2050_s17  ;;  %p2059_p6 = scmp.lt.s32.totalorder %s2050_s17, %s2050_s17 }
  0x25   : > { %p2053_p1 = pnand %p2051_p9, %p2015_p0  ;;  %p2060_p7 = por %p2059_p6, %p2058_p10 }
  0x27   : > { %p2054_p3 = pneg %p2053_p1 }
  0x29   : > { %p2061_p2 = pnand %p2060_p7, %p2054_p3 }
  0x2b   : > { %2064 = shalt.err (!%p2061_p2)
}
  0x2c   : > { %s2167_s22 = smov 128   ;;  %s2168_s25 = smov 8  }
  0x2d   : > { %1918 = dma.hbm_to_vmem [thread:$0]  (!%p2285_p13), %s2872_s6, 2048, %s289_s26, [#allocation8], %s2167_s22, %s2167_s22, %s2168_s25  }
  0x2e   : > { %316 = sbr.rel (%p2277_p11) target bundleno = 1315 (0x523), region = 52 }
  0x33   : > { %p2900_p4 = scmp.eq.s32.totalorder %s2246_s13, 0 }
  0x35   : > { %2132 = dma.done.wait (%p2900_p4), [#allocation5], 6144   ;;  %p2901_p9 = pmov %p2900_p4 }
  0x36   : > { %p2902_p6 = pmov %p2900_p4 }
  0x37   : > { %2134 = vsyncadd (%p2901_p9), [#allocation5], 4294961152 }
  0x38   : > { %2136 = dma.done.wait (%p2902_p6), [#allocation8], 2048   ;;  %p2903_p10 = pmov %p2900_p4 }
  0x39   : > { %s351_s18 = sand.u32 1, %s2153_s10   ;;  %s1587_s23 = sshll.u32 %s2246_s13, 2 }
  0x3a   : > { %2138 = vsyncadd (%p2903_p10), [#allocation8], 4294965248  ;;  %s1586_s21 = sshll.u32 %s351_s18, 5  ;;  %p357_p11 = scmp.lt.s32.totalorder %s1587_s23, 7 }
  0x3b   : > { %s2326_s14 = scalar_lea.vmem [#allocation9], %s1586_s21  ;;  %p2904_p13 = scmp.ne.s32.totalorder %s2246_s13, 0 }
  0x3c   : > { %s2953_s23 = smov (!%p357_p11, %s1587_s23), 7 }
  0x3d   : > { %s1588_s24 = sshll.u32 %s2953_s23, 3  ;;  %366 = sbr.rel (%p2904_p13) target bundleno = 68 (0x44), region = 64 }
  0x3e   : > { %s2324_s29 = scalar_lea.vmem %s2866_s0, %s1588_s24 }
  0x42   : > { %v367_v0 = vld [vmem:[%s2867_s1] sm:$0xff] }
  0x43   : > { %368 = vst [vmem:[#allocation10] sm:$0xff] %v367_v0 }
  0x44 PF: > { %v2333_v1 = vld [vmem:[#allocation4 + $0x170] sm:$0xff]  ;;  %v2335_v2 = vld [vmem:[#allocation4 + $0x168] sm:$0xff]  ;;  %v2337_v3 = vld [vmem:[#allocation4 + $0x158] sm:$0xff]  ;;  %v2878_v5 = vmov 0.0   ;;  %vm396_vm0 = vcmask 130048   ;;  %vm2170_vm1 = vmmov 0   ;;  %v381_v61 = vlaneseq }
  0x45   : > { %2905 = vst [vmem:[#allocation17_spill] sm:$0xff] %v2333_v1  ;;  %651 = vmatprep.subr.mxu0 %v2333_v1  ;;  %v2340_v4 = vld [vmem:[#allocation4 + $0x150] sm:$0xff]  ;;  %473 = vmatprep.mubr.f32.mxu1 %v2878_v5  ;;  %v2344_v6 = vld [vmem:[#allocation4 + $0x140] sm:$0xff]  ;;  %v2348_v7 = vld [vmem:[#allocation4 + $0x138] sm:$0xff]  ;;  %s2171_s28 = smov [#allocation10]   ;;  %p2942_p8 = scmp.eq.s32.totalorder %s2246_s13, 1 }
  0x46   : > { %652 = vmatpush1.msra.mxu0 %v2335_v2  ;;  %715 = vmatprep.mubr.f32.mxu0 %v2878_v5  ;;  %v377_v8 = vld [vmem:[%s2868_s2 + $0x20] sm:$0xff]  ;;  %v2354_v9 = vld [vmem:[#allocation4 + $0x128] sm:$0xff]  ;;  %v376_v10 = vld [vmem:[%s2868_s2 + $0x18] sm:$0xff]  ;;  %v382_v62 = vshrl.u32 %v381_v61, 7  ;;  %s1483_s16 = sshll.u32 %s2171_s28, 4  ;;  %s1484_s16 = int_to_ptr.vmem [resolvable:$true] %s1483_s16 }
  0x47   : > { %653 = vmatprep.subr.mxu0 %v2337_v3  ;;  %437 = vmatprep.subr.mxu1 %v377_v8  ;;  %v2360_v11 = vld [vmem:[#allocation4 + $0x120] sm:$0xff]  ;;  %v374_v12 = vld [vmem:[%s2868_s2 + $0x8] sm:$0xff]  ;;  %v2369_v14 = vld [vmem:[#allocation4 + $0x110] sm:$0xff]  ;;  %s2065_s17 = scalar_lea.vmem %s1484_s16, 128  ;;  %p2072_p3 = scmp.lt.s32.totalorder %s1484_s16, %s1484_s16 }
  0x48   : > { %654 = vmatpush1.msra.mxu0 %v2340_v4  ;;  %438 = vmatpush1.msra.mxu1 %v376_v10  ;;  %v373_v13 = vld [vmem:[%s2868_s2] sm:$0xff]  ;;  %v2373_v16 = vld [vmem:[#allocation4 + $0x108] sm:$0xff]  ;;  %v2379_v18 = vld [vmem:[#allocation4 + $0xf8] sm:$0xff]  ;;  %v383_v63 = vsub.s32 0, %v382_v62  ;;  %v387_v10 = vsub.s32 1, %v382_v62  ;;  %v391_v61 = vsub.s32 2, %v382_v62  ;;  %p2066_p0 = scmp.ne.s32.totalorder %s1484_s16, %s2065_s17  ;;  %p2073_p7 = scmp.lt.s32.totalorder %s2065_s17, %s2065_s17 }
  0x49   : > { %655 = vmatprep.subr.mxu0 %v2344_v6  ;;  %439 = vmatprep.subr.mxu1 %v374_v12  ;;  %v369_v15 = vld [vmem:[%s2324_s29] sm:$0xff]  ;;  %v378_v17 = vld [vmem:[%s2868_s2 + $0x28] sm:$0xff]  ;;  %v2383_v19 = vld [vmem:[#allocation4 + $0xf0] sm:$0xff] }
  0x4a   : > { %656 = vmatpush1.msra.mxu0 %v2348_v7  ;;  %440 = vmatpush1.msra.mxu1 %v373_v13  ;;  %v370_v20 = vld [vmem:[%s2324_s29 + $0x8] sm:$0xff]  ;;  %v2387_v21 = vld [vmem:[#allocation4 + $0xe0] sm:$0xff]  ;;  %v2390_v22 = vld [vmem:[#allocation4 + $0xd8] sm:$0xff]  ;;  %p2067_p12 = pnand %p2066_p0, %p2942_p8  ;;  %p2074_p2 = por %p2073_p7, %p2072_p3 }
  0x4b   : > { %657 = vmatprep.subr.mxu0 %v2354_v9  ;;  %1590 = vmatmul.mubr.msk.f32.vlgmr.msra.gmra.mxu1 %vm396_vm0, %v369_v15  ;;  %v375_v23 = vld [vmem:[%s2868_s2 + $0x10] sm:$0xff]  ;;  %v2397_v24 = vld [vmem:[#allocation4 + $0xc8] sm:$0xff]  ;;  %v2401_v25 = vld [vmem:[#allocation4 + $0xc0] sm:$0xff] }
  0x4c   : > { %658 = vmatpush1.msra.mxu0 %v2360_v11  ;;  %1710 = vmatprep.subr.mxu1 %v378_v17  ;;  %v2405_v26 = vld [vmem:[%s2324_s29 + $0x10] sm:$0xff]  ;;  %v2411_v28 = vld [vmem:[#allocation4 + $0xa8] sm:$0xff]  ;;  %v2414_v29 = vld [vmem:[#allocation4 + $0x98] sm:$0xff]  ;;  %p2068_p1 = pneg %p2067_p12 }
  0x4d   : > { %659 = vmatprep.subr.mxu0 %v2369_v14  ;;  %1711 = vmatpush3.msra.mxu1 %v378_v17  ;;  %v2408_v27 = vld [vmem:[#allocation4 + $0xb0] sm:$0xff]  ;;  %v372_v31 = vld [vmem:[%s2324_s29 + $0x18] sm:$0xff]  ;;  %v2424_v32 = vld [vmem:[#allocation4 + $0x80] sm:$0xff] }
  0x4e   : > { %660 = vmatpush1.msra.mxu0 %v2373_v16  ;;  %479 = vmatprep.mubr.f32.mxu1 %v2878_v5  ;;  %v2419_v30 = vld [vmem:[#allocation4 + $0x90] sm:$0xff]  ;;  %v2428_v33 = vld [vmem:[#allocation4 + $0x78] sm:$0xff]  ;;  %v2431_v34 = vld [vmem:[#allocation4 + $0x68] sm:$0xff]  ;;  %p2075_p4 = pnand %p2074_p2, %p2068_p1 }
  0x4f   : > { %661 = vmatprep.subr.mxu0 %v2379_v18  ;;  %1591 = vmatmul.mubr.msk.f32.gmra.mxu1 %vm396_vm0, %v370_v20  ;;  %v2435_v35 = vld [vmem:[#allocation4 + $0x60] sm:$0xff]  ;;  %v2439_v36 = vld [vmem:[#allocation4 + $0x50] sm:$0xff]  ;;  %v2441_v37 = vld [vmem:[#allocation4 + $0x178] sm:$0xff] }
  0x50   : > { %662 = vmatpush1.msra.mxu0 %v2383_v19  ;;  %485 = vmatprep.mubr.f32.mxu1 %v2878_v5  ;;  %v2444_v38 = vld [vmem:[#allocation4 + $0x48] sm:$0xff]  ;;  %v2447_v39 = vld [vmem:[#allocation4 + $0x38] sm:$0xff]  ;;  %v2450_v40 = vld [vmem:[#allocation4 + $0x160] sm:$0xff] }
  0x51   : > { %663 = vmatprep.subr.mxu0 %v2387_v21  ;;  %1712 = vmatprep.subr.mxu1 %v375_v23  ;;  %v2453_v41 = vld [vmem:[#allocation4 + $0x30] sm:$0xff]  ;;  %v2457_v42 = vld [vmem:[#allocation4 + $0x20] sm:$0xff]  ;;  %v2460_v43 = vld [vmem:[#allocation4 + $0x148] sm:$0xff] }
  0x52   : > { %664 = vmatpush1.msra.mxu0 %v2390_v22  ;;  %1713 = vmatpush3.msra.mxu1 %v375_v23  ;;  %2906 = vst [vmem:[#allocation18_spill] sm:$0xff] %v2457_v42  ;;  %v2463_v44 = vld [vmem:[#allocation4 + $0x18] sm:$0xff]  ;;  %v2467_v45 = vld [vmem:[#allocation4 + $0x8] sm:$0xff]  ;;  %v2470_v46 = vld [vmem:[#allocation4 + $0x130] sm:$0xff] }
  0x53   : > { %665 = vmatprep.subr.mxu0 %v2397_v24  ;;  %1592 = vmatmul.mubr.msk.f32.gmra.mxu1 %vm396_vm0, %v2405_v26  ;;  %2907 = vst [vmem:[#allocation19_spill] sm:$0xff] %v2463_v44  ;;  %2908 = vst [vmem:[#allocation20_spill] sm:$0xff] %v2467_v45  ;;  %v2473_v47 = vld [vmem:[#allocation4] sm:$0xff]  ;;  %v2480_v49 = vld [vmem:[#allocation4 + $0x118] sm:$0xff] }
  0x54   : > { %666 = vmatpush1.msra.mxu0 %v2401_v25  ;;  %491 = vmatprep.mubr.f32.mxu1 %v2878_v5  ;;  %2909 = vst [vmem:[#allocation21_spill] sm:$0xff] %v2473_v47  ;;  %v2477_v48 = vld [vmem:[#allocation10] sm:$0xff]  ;;  %v2491_v51 = vld [vmem:[#allocation4 + $0xe8] sm:$0xff]  ;;  %v2498_v52 = vld [vmem:[#allocation4 + $0xd0] sm:$0xff] }
  0x55   : > { %667 = vmatprep.subr.mxu0 %v2408_v27  ;;  %1720 = vmatprep.subr.mxu1 %v2878_v5  ;;  %v2486_v50 = vld [vmem:[#allocation4 + $0x100] sm:$0xff]  ;;  %v2505_v53 = vld [vmem:[#allocation4 + $0xb8] sm:$0xff]  ;;  %v2517_v55 = vld [vmem:[#allocation4 + $0x88] sm:$0xff] }
  0x56   : > { %668 = vmatpush1.msra.mxu0 %v2411_v28  ;;  %v2511_v54 = vld [vmem:[#allocation4 + $0xa0] sm:$0xff]  ;;  %v2523_v56 = vld [vmem:[#allocation4 + $0x70] sm:$0xff]  ;;  %v2529_v57 = vld [vmem:[#allocation4 + $0x58] sm:$0xff] }
  0x57   : > { %669 = vmatprep.subr.mxu0 %v2414_v29  ;;  %1593 = vmatmul.mubr.msk.f32.gmra.mxu1 %vm396_vm0, %v372_v31  ;;  %v2535_v58 = vld [vmem:[#allocation4 + $0x40] sm:$0xff]  ;;  %v2541_v59 = vld [vmem:[#allocation4 + $0x28] sm:$0xff]  ;;  %v2547_v60 = vld [vmem:[#allocation4 + $0x10] sm:$0xff] }
  0x58   : > { %670 = vmatpush1.msra.mxu0 %v2419_v30  ;;  %1714 = vmatprep.mubr.msk.f32.mxu1 %vm396_vm0, %v369_v15  ;;  %2910 = vst [vmem:[#allocation22_spill] sm:$0xff] %v2535_v58  ;;  %2911 = vst [vmem:[#allocation23_spill] sm:$0xff] %v2541_v59  ;;  %v379_v0 = vld [vmem:[%s2870_s4] sm:$0x7] }
  0x59   : > { %671 = vmatprep.subr.mxu0 %v2424_v32  ;;  %2912 = vst [vmem:[#allocation24_spill] sm:$0xff] %v2547_v60  ;;  %v384_v13 = vrot.slane %v379_v0, %v383_v63  ;;  %v388_v17 = vrot.slane %v379_v0, %v387_v10 }
  0x5a   : > { %672 = vmatpush1.msra.mxu0 %v2428_v33 }
  0x5b   : > { %673 = vmatprep.subr.mxu0 %v2431_v34  ;;  %1715 = vmatmul.mubr.msk.f32.vlgmr.msra.gmra.mxu1 %vm396_vm0, %v370_v20 }
  0x5c   : > { %674 = vmatpush1.msra.mxu0 %v2435_v35  ;;  %1721 = vmatpush3.msra.mxu1 %v2441_v37 }
  0x5d   : > { %675 = vmatprep.subr.mxu0 %v2439_v36  ;;  %1722 = vmatprep.subr.mxu1 %v2878_v5 }
  0x5e   : > { %676 = vmatpush1.msra.mxu0 %v2444_v38  ;;  %1723 = vmatpush3.msra.mxu1 %v2450_v40 }
  0x5f   : > { %677 = vmatprep.subr.mxu0 %v2447_v39  ;;  %1724 = vmatprep.subr.mxu1 %v2878_v5 }
  0x60   : > { %678 = vmatpush1.msra.mxu0 %v2453_v41  ;;  %1725 = vmatpush3.msra.mxu1 %v2460_v43 }
  0x61   : > { %679 = vmatprep.subr.mxu0 %v2457_v42  ;;  %1726 = vmatprep.subr.mxu1 %v2878_v5 }
  0x62   : > { %680 = vmatpush1.msra.mxu0 %v2463_v44  ;;  %1727 = vmatpush3.msra.mxu1 %v2470_v46 }
  0x63   : > { %681 = vmatprep.subr.mxu0 %v2467_v45  ;;  %1728 = vmatprep.subr.mxu1 %v2878_v5 }
  0x64   : > { %682 = vmatpush1.msra.mxu0 %v2473_v47  ;;  %1729 = vmatpush3.msra.mxu1 %v2480_v49 }
  0x65   : > { %716 = vmatmul.mubr.f32.vlgmr.msra.gmra.mxu0 %v2477_v48  ;;  %1730 = vmatprep.subr.mxu1 %v2878_v5 }
  0x66   : > { %1717 = vmatprep.mubr.msk.f32.mxu1 %vm396_vm0, %v2405_v26  ;;  %1731 = vmatpush3.msra.mxu1 %v2486_v50 }
  0x67   : > { %827 = vmatprep.subr.mxu0 %v2333_v1  ;;  %1732 = vmatprep.subr.mxu1 %v2878_v5 }
  0x68   : > { %1718 = vmatmul.mubr.msk.f32.gmra.mxu1 %vm396_vm0, %v372_v31  ;;  %828 = vmatpush1.msra.mxu0 %v2335_v2 }
  0x69   : > { %1733 = vmatpush3.msra.mxu1 %v2491_v51  ;;  %1752 = vmatprep.mubr.msk.f32.mxu1 %vm2170_vm1, %v2878_v5 }
  0x6a   : > { %1734 = vmatprep.subr.mxu1 %v2878_v5  ;;  %829 = vmatprep.subr.mxu0 %v2337_v3 }
  0x6b   : > { %1735 = vmatpush3.msra.mxu1 %v2498_v52  ;;  %830 = vmatpush1.msra.mxu0 %v2340_v4 }
  0x6c   : > { %1736 = vmatprep.subr.mxu1 %v2878_v5  ;;  %831 = vmatprep.subr.mxu0 %v2344_v6 }
  0x6d   : > { %1737 = vmatpush3.msra.mxu1 %v2505_v53  ;;  %832 = vmatpush1.msra.mxu0 %v2348_v7 }
  0x6e   : > { %1738 = vmatprep.subr.mxu1 %v2878_v5  ;;  %833 = vmatprep.subr.mxu0 %v2354_v9 }
  0x6f   : > { %1739 = vmatpush3.msra.mxu1 %v2511_v54  ;;  %834 = vmatpush1.msra.mxu0 %v2360_v11 }
  0x70   : > { %1740 = vmatprep.subr.mxu1 %v2878_v5  ;;  %835 = vmatprep.subr.mxu0 %v2369_v14 }
  0x71   : > { %1741 = vmatpush3.msra.mxu1 %v2517_v55  ;;  %836 = vmatpush1.msra.mxu0 %v2373_v16 }
  0x72   : > { %1742 = vmatprep.subr.mxu1 %v2878_v5  ;;  %837 = vmatprep.subr.mxu0 %v2379_v18 }
  0x73   : > { %1743 = vmatpush3.msra.mxu1 %v2523_v56  ;;  %838 = vmatpush1.msra.mxu0 %v2383_v19 }
  0x74   : > { %1744 = vmatprep.subr.mxu1 %v2878_v5  ;;  %839 = vmatprep.subr.mxu0 %v2387_v21 }
  0x75   : > { %1745 = vmatpush3.msra.mxu1 %v2529_v57  ;;  %840 = vmatpush1.msra.mxu0 %v2390_v22 }
  0x76   : > { %1746 = vmatprep.subr.mxu1 %v2878_v5  ;;  %841 = vmatprep.subr.mxu0 %v2397_v24 }
  0x77   : > { %1747 = vmatpush3.msra.mxu1 %v2535_v58  ;;  %842 = vmatpush1.msra.mxu0 %v2401_v25 }
  0x78   : > { %1748 = vmatprep.subr.mxu1 %v2878_v5  ;;  %843 = vmatprep.subr.mxu0 %v2408_v27 }
  0x79   : > { %1749 = vmatpush3.msra.mxu1 %v2541_v59  ;;  %844 = vmatpush1.msra.mxu0 %v2411_v28 }
  0x7a   : > { %1750 = vmatprep.subr.mxu1 %v2878_v5  ;;  %845 = vmatprep.subr.mxu0 %v2414_v29 }
  0x7b   : > { %1751 = vmatpush3.msra.mxu1 %v2547_v60  ;;  %846 = vmatpush1.msra.mxu0 %v2419_v30 }
  0x7c   : > { %1753 = vmatmul.mubr.f32.vlgmr.msra.gmra.mxu1 %v2477_v48  ;;  %1755 = vmatprep.subr.mxu1 %v2878_v5 }
  0x7d   : > { %1756 = vmatpush3.msra.mxu1 %v2441_v37  ;;  %847 = vmatprep.subr.mxu0 %v2424_v32 }
  0x7e   : > { %1757 = vmatprep.subr.mxu1 %v2878_v5  ;;  %848 = vmatpush1.msra.mxu0 %v2428_v33 }
  0x7f   : > { %1758 = vmatpush3.msra.mxu1 %v2450_v40  ;;  %849 = vmatprep.subr.mxu0 %v2431_v34 }
  0x80   : > { %1759 = vmatprep.subr.mxu1 %v2878_v5  ;;  %850 = vmatpush1.msra.mxu0 %v2435_v35 }
  0x81   : > { %1760 = vmatpush3.msra.mxu1 %v2460_v43  ;;  %851 = vmatprep.subr.mxu0 %v2439_v36 }
  0x82   : > { %1761 = vmatprep.subr.mxu1 %v2878_v5  ;;  %852 = vmatpush1.msra.mxu0 %v2444_v38 }
  0x83   : > { %1762 = vmatpush3.msra.mxu1 %v2470_v46  ;;  %853 = vmatprep.subr.mxu0 %v2447_v39 }
  0x84   : > { %1763 = vmatprep.subr.mxu1 %v2878_v5  ;;  %854 = vmatpush1.msra.mxu0 %v2453_v41 }
  0x85   : > { %1764 = vmatpush3.msra.mxu1 %v2480_v49  ;;  %855 = vmatprep.subr.mxu0 %v2457_v42 }
  0x86   : > { %1765 = vmatprep.subr.mxu1 %v2878_v5  ;;  %856 = vmatpush1.msra.mxu0 %v2463_v44 }
  0x87   : > { %1766 = vmatpush3.msra.mxu1 %v2486_v50  ;;  %857 = vmatprep.subr.mxu0 %v2467_v45 }
  0x88   : > { %1767 = vmatprep.subr.mxu1 %v2878_v5  ;;  %858 = vmatpush1.msra.mxu0 %v2473_v47 }
  0x89   : > { %1768 = vmatpush3.msra.mxu1 %v2491_v51  ;;  %891 = vmatprep.mubr.f32.mxu0 %v2878_v5 }
  0x8a   : > { %1769 = vmatprep.subr.mxu1 %v2878_v5  ;;  %1787 = vmatprep.mubr.msk.f32.mxu1 %vm2170_vm1, %v2878_v5 }
  0x8b   : > { %1770 = vmatpush3.msra.mxu1 %v2498_v52  ;;  %998 = vmatprep.subr.mxu0 %v2333_v1 }
  0x8c   : > { %1771 = vmatprep.subr.mxu1 %v2878_v5 }
  0x8d   : > { %1772 = vmatpush3.msra.mxu1 %v2505_v53 }
  0x8e   : > { %1773 = vmatprep.subr.mxu1 %v2878_v5 }
  0x8f   : > { %1774 = vmatpush3.msra.mxu1 %v2511_v54 }
  0x90   : > { %1775 = vmatprep.subr.mxu1 %v2878_v5 }
  0x91   : > { %1776 = vmatpush3.msra.mxu1 %v2517_v55 }
  0x92   : > { %1777 = vmatprep.subr.mxu1 %v2878_v5 }
  0x93   : > { %1778 = vmatpush3.msra.mxu1 %v2523_v56 }
  0x94   : > { %1779 = vmatprep.subr.mxu1 %v2878_v5 }
  0x95   : > { %1780 = vmatpush3.msra.mxu1 %v2529_v57 }
  0x96   : > { %1781 = vmatprep.subr.mxu1 %v2878_v5 }
  0x97   : > { %1782 = vmatpush3.msra.mxu1 %v2535_v58 }
  0x98   : > { %1783 = vmatprep.subr.mxu1 %v2878_v5 }
  0x99   : > { %1784 = vmatpush3.msra.mxu1 %v2541_v59  ;;  %v392_v59 = vrot.slane %v379_v0, %v391_v61 }
  0x9a   : > { %1785 = vmatprep.subr.mxu1 %v2878_v5 }
  0x9b   : > { %1786 = vmatpush3.msra.mxu1 %v2547_v60 }
  0x9c   : > { %1790 = vmatprep.subr.mxu1 %v2878_v5 }
 0x10b   : > { %v475_v8 = vpop.f32.mrf.mxu1 }
 0x10d   : > { %v477_v12 = vpop.f32.mrf.mxu1 }
 0x10f   : > { %v481_v15 = vpop.f32.mrf.mxu1 }
 0x110   : > { %v2610_v20 = vadd.f32 %v481_v15, %v384_v13 }
 0x111   : > { %v483_v23 = vpop.f32.mrf.mxu1 }
 0x112   : > { %2913 = vst [vmem:[#allocation25_spill] sm:$0xff] %v2610_v20  ;;  %v2612_v26 = vadd.f32 %v483_v23, %v388_v17  ;;  %v476_v20 = vadd.f32 %v475_v8, %v384_v13 }
 0x113   : > { %v487_v31 = vpop.f32.mrf.mxu1 }
 0x114   : > { %2914 = vst [vmem:[#allocation26_spill] sm:$0xff] %v2612_v26  ;;  %v2614_v5 = vadd.f32 %v487_v31, %v384_v13 }
 0x115   : > { %v489_v1 = vpop.f32.mrf.mxu1 }
 0x116   : > { %2915 = vst [vmem:[#allocation27_spill] sm:$0xff] %v2614_v5  ;;  %v2616_v60 = vadd.f32 %v489_v1, %v388_v17  ;;  %v478_v1 = vadd.f32 %v477_v12, %v388_v17 }
 0x117   : > { %v493_v47 = vpop.f32.mrf.mxu1 }
 0x118   : > { %2916 = vst [vmem:[#allocation28_spill] sm:$0xff] %v2616_v60  ;;  %v2618_v45 = vadd.f32 %v493_v47, %v384_v13 }
 0x119   : > { %v495_v44 = vpop.f32.mrf.mxu1 }
 0x11a   : > { %2917 = vst [vmem:[#allocation29_spill] sm:$0xff] %v2618_v45  ;;  %v2620_v63 = vadd.f32 %v495_v44, %v388_v17 }
 0x11b   : > { %v1716_v10 = vpop.f32.mrf.mxu1 }
 0x11c   : > { %2918 = vst [vmem:[#allocation30_spill] sm:$0xff] %v2620_v63  ;;  %v2622_v15 = vadd.f32 %v1716_v10, %v392_v59 }
 0x11d   : > { %v564_v42 = vpop.f32.mrf.mxu1 }
 0x125   : > { %v717_v23 = vpop.f32.mrf.mxu0 }
 0x126   : > { %v792_v26 = vadd.f32 %v717_v23, %v476_v20  ;;  %v565_v23 = vadd.f32 %v564_v42, %v392_v59  ;;  %v2921_v42 = vmov 0.0  }
 0x127   : > { %v719_v62 = vpop.f32.mrf.mxu0 }
 0x128   : > { %v1598_v31 = vmul.f32 -1.442695, %v792_v26  ;;  %v1719_v5 = vpop.f32.mrf.mxu1  ;;  %v799_v0 = vadd.f32 %v719_v62, %v478_v1  ;;  %v2631_v26 = vld [vmem:[%s2871_s5] ss:$0 sm:$0xff] }
 0x129   : > { %v2624_v58 = vadd.f32 %v1719_v5, %v392_v59 }
 0x12a   : > { %1973 = vpow2.f32 %v1598_v31  ;;  %v574_v47 = vpop.f32.mrf.mxu1  ;;  %v1599_v44 = vmul.f32 -1.442695, %v799_v0 }
 0x12b   : > { %2919 = vst [vmem:[#allocation31_spill] sm:$0xff] %v2624_v58  ;;  %v2626_v45 = vadd.f32 %v574_v47, %v392_v59  ;;  %v2923_v59 = vld [vmem:[#allocation18_spill] sm:$0xff] }
 0x12c   : > { %1975 = vpow2.f32 %v1599_v44 }
 0x12d   : > { %2920 = vst [vmem:[#allocation32_spill] sm:$0xff] %v2626_v45 }
 0x137   : > { %v1974_v61 = vpop.eup %1973 }
 0x138   : > { %v796_v10 = vadd.f32 1.0, %v1974_v61 }
 0x139   : > { %v1976_v20 = vpop.eup %1975 }
 0x13a   : > { %1977 = vrcp.f32 %v796_v10  ;;  %v803_v5 = vadd.f32 1.0, %v1976_v20  ;;  %v2926_v20 = vld [vmem:[#allocation20_spill] sm:$0xff] }
 0x13c   : > { %v788_v8 = vpop.f32.mrf.mxu1  ;;  %1979 = vrcp.f32 %v803_v5  ;;  %v2927_v5 = vld [vmem:[#allocation21_spill] sm:$0xff] }
 0x13d   : > { %v812_v12 = vadd.f32 %v2631_v26, %v788_v8  ;;  %v2924_v8 = vld [vmem:[#allocation19_spill] sm:$0xff] }
 0x13e   : > { %v1754_v13 = vpop.f32.mrf.mxu1 }
 0x13f   : > { %v2925_v13 = vld [vmem:[#allocation23_spill] sm:$0xff] }
 0x147   : > { %v1978_v17 = vpop.eup %1977 }
 0x148   : > { %v813_v31 = vmul.f32 %v1978_v17, %v812_v12  ;;  %v2928_v12 = vld [vmem:[#allocation24_spill] sm:$0xff]  ;;  %v2929_v17 = vld [vmem:[#allocation17_spill] sm:$0xff] }
 0x149   : > { %v1980_v1 = vpop.eup %1979 }
 0x14a   : > { %v814_v62 = vadd.f32 %v813_v31, %v565_v23  ;;  %v816_v47 = vsub.f32 1.0, %v1980_v1  ;;  %v818_v61 = vmul.f32 %v1980_v1, %v2477_v48  ;;  %v2922_v48 = vld [vmem:[#allocation22_spill] sm:$0xff] }
 0x14c   : > { %1981 = vtanh.f32 %v814_v62  ;;  %v2930_v62 = vld [vmem:[#allocation25_spill] sm:$0xff] }
 0x159   : > { %v1982_v0 = vpop.eup %1981 }
 0x15a   : > { %v817_v44 = vmul.f32 %v1982_v0, %v816_v47 }
 0x15c   : > { %v2635_v10 = vadd.f32 %v818_v61, %v817_v44  ;;  %v2931_v61 = vld [vmem:[#allocation26_spill] sm:$0xff] }
 0x15e   : > { %892 = vmatmul.mubr.f32.vlgmr.msra.gmra.mxu0 %v2635_v10  ;;  %1788 = vmatmul.mubr.f32.vlgmr.msra.gmra.mxu1 %v2635_v10 }
 0x15f   : > { %999 = vmatpush1.msra.mxu0 %v2335_v2  ;;  %1791 = vmatpush3.msra.mxu1 %v2441_v37 }
 0x160   : > { %1000 = vmatprep.subr.mxu0 %v2337_v3  ;;  %1792 = vmatprep.subr.mxu1 %v2921_v42 }
 0x161   : > { %1001 = vmatpush1.msra.mxu0 %v2340_v4  ;;  %1793 = vmatpush3.msra.mxu1 %v2450_v40 }
 0x162   : > { %1002 = vmatprep.subr.mxu0 %v2344_v6  ;;  %1794 = vmatprep.subr.mxu1 %v2921_v42 }
 0x163   : > { %1003 = vmatpush1.msra.mxu0 %v2348_v7  ;;  %1795 = vmatpush3.msra.mxu1 %v2460_v43 }
 0x164   : > { %1004 = vmatprep.subr.mxu0 %v2354_v9  ;;  %1796 = vmatprep.subr.mxu1 %v2921_v42 }
 0x165   : > { %1005 = vmatpush1.msra.mxu0 %v2360_v11  ;;  %1797 = vmatpush3.msra.mxu1 %v2470_v46 }
 0x166   : > { %1006 = vmatprep.subr.mxu0 %v2369_v14  ;;  %1798 = vmatprep.subr.mxu1 %v2921_v42 }
 0x167   : > { %1007 = vmatpush1.msra.mxu0 %v2373_v16  ;;  %1799 = vmatpush3.msra.mxu1 %v2480_v49 }
 0x168   : > { %1008 = vmatprep.subr.mxu0 %v2379_v18  ;;  %1800 = vmatprep.subr.mxu1 %v2921_v42 }
 0x169   : > { %1009 = vmatpush1.msra.mxu0 %v2383_v19  ;;  %1801 = vmatpush3.msra.mxu1 %v2486_v50 }
 0x16a   : > { %1010 = vmatprep.subr.mxu0 %v2387_v21  ;;  %1802 = vmatprep.subr.mxu1 %v2921_v42 }
 0x16b   : > { %1011 = vmatpush1.msra.mxu0 %v2390_v22  ;;  %1803 = vmatpush3.msra.mxu1 %v2491_v51 }
 0x16c   : > { %1012 = vmatprep.subr.mxu0 %v2397_v24  ;;  %1804 = vmatprep.subr.mxu1 %v2921_v42 }
 0x16d   : > { %1013 = vmatpush1.msra.mxu0 %v2401_v25  ;;  %1805 = vmatpush3.msra.mxu1 %v2498_v52 }
 0x16e   : > { %1014 = vmatprep.subr.mxu0 %v2408_v27  ;;  %1806 = vmatprep.subr.mxu1 %v2921_v42 }
 0x16f   : > { %1015 = vmatpush1.msra.mxu0 %v2411_v28  ;;  %1807 = vmatpush3.msra.mxu1 %v2505_v53 }
 0x170   : > { %1016 = vmatprep.subr.mxu0 %v2414_v29  ;;  %1808 = vmatprep.subr.mxu1 %v2921_v42 }
 0x171   : > { %1017 = vmatpush1.msra.mxu0 %v2419_v30  ;;  %1809 = vmatpush3.msra.mxu1 %v2511_v54 }
 0x172   : > { %1018 = vmatprep.subr.mxu0 %v2424_v32  ;;  %1810 = vmatprep.subr.mxu1 %v2921_v42 }
 0x173   : > { %1019 = vmatpush1.msra.mxu0 %v2428_v33  ;;  %1811 = vmatpush3.msra.mxu1 %v2517_v55 }
 0x174   : > { %1020 = vmatprep.subr.mxu0 %v2431_v34  ;;  %1812 = vmatprep.subr.mxu1 %v2921_v42 }
 0x175   : > { %1021 = vmatpush1.msra.mxu0 %v2435_v35  ;;  %1813 = vmatpush3.msra.mxu1 %v2523_v56 }
 0x176   : > { %1022 = vmatprep.subr.mxu0 %v2439_v36  ;;  %1814 = vmatprep.subr.mxu1 %v2921_v42 }
 0x177   : > { %1023 = vmatpush1.msra.mxu0 %v2444_v38  ;;  %1815 = vmatpush3.msra.mxu1 %v2529_v57 }
 0x178   : > { %1024 = vmatprep.subr.mxu0 %v2447_v39  ;;  %1816 = vmatprep.subr.mxu1 %v2921_v42 }
 0x179   : > { %1025 = vmatpush1.msra.mxu0 %v2453_v41  ;;  %1817 = vmatpush3.msra.mxu1 %v2922_v48 }
 0x17a   : > { %1026 = vmatprep.subr.mxu0 %v2923_v59  ;;  %1818 = vmatprep.subr.mxu1 %v2921_v42 }
 0x17b   : > { %1027 = vmatpush1.msra.mxu0 %v2924_v8  ;;  %1819 = vmatpush3.msra.mxu1 %v2925_v13 }
 0x17c   : > { %1028 = vmatprep.subr.mxu0 %v2926_v20  ;;  %1820 = vmatprep.subr.mxu1 %v2921_v42 }
 0x17d   : > { %1029 = vmatpush1.msra.mxu0 %v2927_v5  ;;  %1062 = vmatprep.mubr.f32.mxu0 %v2921_v42 }
 0x17e   : > { %1821 = vmatpush3.msra.mxu1 %v2928_v12  ;;  %1822 = vmatprep.mubr.msk.f32.mxu1 %vm2170_vm1, %v2921_v42 }
 0x17f   : > { %1169 = vmatprep.subr.mxu0 %v2929_v17  ;;  %1825 = vmatprep.subr.mxu1 %v2921_v42 }
 0x21e   : > { %v893_v23 = vpop.f32.mrf.mxu0  ;;  %v964_v31 = vpop.f32.mrf.mxu1 }
 0x21f   : > { %v968_v1 = vadd.f32 %v893_v23, %v2930_v62  ;;  %v982_v17 = vadd.f32 %v2631_v26, %v964_v31 }
 0x220   : > { %v1789_v47 = vpop.f32.mrf.mxu1  ;;  %v895_v44 = vpop.f32.mrf.mxu0 }
 0x221   : > { %v1601_v0 = vmul.f32 -1.442695, %v968_v1  ;;  %v975_v58 = vadd.f32 %v895_v44, %v2931_v61 }
 0x223   : > { %1983 = vpow2.f32 %v1601_v0  ;;  %v1602_v63 = vmul.f32 -1.442695, %v975_v58 }
 0x225   : > { %1985 = vpow2.f32 %v1602_v63 }
 0x230   : > { %v1984_v45 = vpop.eup %1983 }
 0x231   : > { %v972_v60 = vadd.f32 1.0, %v1984_v45  ;;  %v1357_v45 = vld [vmem:[#allocation7 + $0x70] sm:$0xff] }
 0x232   : > { %v1986_v12 = vpop.eup %1985 }
 0x233   : > { %1987 = vrcp.f32 %v972_v60  ;;  %v979_v5 = vadd.f32 1.0, %v1986_v12  ;;  %v1347_v60 = vld [vmem:[#allocation7 + $0x20] sm:$0xff] }
 0x235   : > { %1989 = vrcp.f32 %v979_v5  ;;  %v2939_v5 = vld [vmem:[#allocation29_spill] sm:$0xff] }
 0x240   : > { %v1988_v20 = vpop.eup %1987 }
 0x241   : > { %v983_v13 = vmul.f32 %v1988_v20, %v982_v17  ;;  %v2940_v17 = vld [vmem:[#allocation30_spill] sm:$0xff] }
 0x242   : > { %v1990_v62 = vpop.eup %1989 }
 0x243   : > { %v984_v23 = vadd.f32 %v983_v13, %v2622_v15  ;;  %v986_v1 = vsub.f32 1.0, %v1990_v62  ;;  %v988_v58 = vmul.f32 %v1990_v62, %v2635_v10  ;;  %v1346_v15 = vld [vmem:[#allocation7 + $0x18] sm:$0xff] }
 0x245   : > { %1991 = vtanh.f32 %v984_v23 }
 0x252   : > { %v1992_v47 = vpop.eup %1991 }
 0x253   : > { %v987_v0 = vmul.f32 %v1992_v47, %v986_v1 }
 0x255   : > { %v2711_v63 = vadd.f32 %v988_v58, %v987_v0  ;;  %v1607_v58 = vld [vmem:[%s2873_s7] ss:$0 sm:$0xff] }
 0x257   : > { %1063 = vmatmul.mubr.f32.vlgmr.msra.gmra.mxu0 %v2711_v63  ;;  %1823 = vmatmul.mubr.f32.vlgmr.msra.gmra.mxu1 %v2711_v63 }
 0x258   : > { %1170 = vmatpush1.msra.mxu0 %v2335_v2  ;;  %1826 = vmatpush3.msra.mxu1 %v2441_v37  ;;  %v2932_v2 = vld [vmem:[#allocation23_spill] sm:$0xff] }
 0x259   : > { %1171 = vmatprep.subr.mxu0 %v2337_v3  ;;  %1827 = vmatprep.subr.mxu1 %v2921_v42  ;;  %v2933_v3 = vld [vmem:[#allocation20_spill] sm:$0xff] }
 0x25a   : > { %1172 = vmatpush1.msra.mxu0 %v2340_v4  ;;  %1828 = vmatpush3.msra.mxu1 %v2450_v40  ;;  %v2934_v4 = vld [vmem:[#allocation21_spill] sm:$0xff] }
 0x25b   : > { %1173 = vmatprep.subr.mxu0 %v2344_v6  ;;  %1829 = vmatprep.subr.mxu1 %v2921_v42  ;;  %v2935_v6 = vld [vmem:[#allocation24_spill] sm:$0xff] }
 0x25c   : > { %1174 = vmatpush1.msra.mxu0 %v2348_v7  ;;  %1830 = vmatpush3.msra.mxu1 %v2460_v43  ;;  %v1358_v7 = vld [vmem:[#allocation7 + $0x78] sm:$0xff] }
 0x25d   : > { %1175 = vmatprep.subr.mxu0 %v2354_v9  ;;  %1831 = vmatprep.subr.mxu1 %v2921_v42 }
 0x25e   : > { %1176 = vmatpush1.msra.mxu0 %v2360_v11  ;;  %1832 = vmatpush3.msra.mxu1 %v2470_v46  ;;  %v1339_v46 = vmax.f32 %v2635_v10, 0.0  ;;  %v1345_v10 = vld [vmem:[#allocation7 + $0x10] sm:$0xff] }
 0x25f   : > { %1177 = vmatprep.subr.mxu0 %v2369_v14  ;;  %1833 = vmatprep.subr.mxu1 %v2921_v42  ;;  %v2936_v14 = vld [vmem:[#allocation27_spill] sm:$0xff] }
 0x260   : > { %1178 = vmatpush1.msra.mxu0 %v2373_v16  ;;  %1834 = vmatpush3.msra.mxu1 %v2480_v49  ;;  %v1356_v49 = vld [vmem:[#allocation7 + $0x68] sm:$0xff] }
 0x261   : > { %1179 = vmatprep.subr.mxu0 %v2379_v18  ;;  %1835 = vmatprep.subr.mxu1 %v2921_v42 }
 0x262   : > { %1180 = vmatpush1.msra.mxu0 %v2383_v19  ;;  %1836 = vmatpush3.msra.mxu1 %v2486_v50  ;;  %v1355_v50 = vld [vmem:[#allocation7 + $0x60] sm:$0xff] }
 0x263   : > { %1181 = vmatprep.subr.mxu0 %v2387_v21  ;;  %1837 = vmatprep.subr.mxu1 %v2921_v42 }
 0x264   : > { %1182 = vmatpush1.msra.mxu0 %v2390_v22  ;;  %1838 = vmatpush3.msra.mxu1 %v2491_v51  ;;  %v2937_v22 = vld [vmem:[#allocation28_spill] sm:$0xff]  ;;  %v1354_v51 = vld [vmem:[#allocation7 + $0x58] sm:$0xff] }
 0x265   : > { %1183 = vmatprep.subr.mxu0 %v2397_v24  ;;  %1839 = vmatprep.subr.mxu1 %v2921_v42 }
 0x266   : > { %1184 = vmatpush1.msra.mxu0 %v2401_v25  ;;  %1840 = vmatpush3.msra.mxu1 %v2498_v52  ;;  %v1353_v52 = vld [vmem:[#allocation7 + $0x50] sm:$0xff] }
 0x267   : > { %1185 = vmatprep.subr.mxu0 %v2408_v27  ;;  %1841 = vmatprep.subr.mxu1 %v2921_v42 }
 0x268   : > { %1186 = vmatpush1.msra.mxu0 %v2411_v28  ;;  %1842 = vmatpush3.msra.mxu1 %v2505_v53  ;;  %v1352_v53 = vld [vmem:[#allocation7 + $0x48] sm:$0xff] }
 0x269   : > { %1187 = vmatprep.subr.mxu0 %v2414_v29  ;;  %1843 = vmatprep.subr.mxu1 %v2921_v42 }
 0x26a   : > { %1188 = vmatpush1.msra.mxu0 %v2419_v30  ;;  %1844 = vmatpush3.msra.mxu1 %v2511_v54  ;;  %v1351_v54 = vld [vmem:[#allocation7 + $0x40] sm:$0xff] }
 0x26b   : > { %1189 = vmatprep.subr.mxu0 %v2424_v32  ;;  %1845 = vmatprep.subr.mxu1 %v2921_v42 }
 0x26c   : > { %1190 = vmatpush1.msra.mxu0 %v2428_v33  ;;  %1846 = vmatpush3.msra.mxu1 %v2517_v55  ;;  %v1350_v55 = vld [vmem:[#allocation7 + $0x38] sm:$0xff] }
 0x26d   : > { %1191 = vmatprep.subr.mxu0 %v2431_v34  ;;  %1847 = vmatprep.subr.mxu1 %v2921_v42 }
 0x26e   : > { %1192 = vmatpush1.msra.mxu0 %v2435_v35  ;;  %1848 = vmatpush3.msra.mxu1 %v2523_v56  ;;  %v2938_v35 = vld [vmem:[#allocation32_spill] sm:$0xff]  ;;  %v1349_v56 = vld [vmem:[#allocation7 + $0x30] sm:$0xff] }
 0x26f   : > { %1193 = vmatprep.subr.mxu0 %v2439_v36  ;;  %1849 = vmatprep.subr.mxu1 %v2921_v42 }
 0x270   : > { %1194 = vmatpush1.msra.mxu0 %v2444_v38  ;;  %1850 = vmatpush3.msra.mxu1 %v2529_v57  ;;  %v1348_v57 = vld [vmem:[#allocation7 + $0x28] sm:$0xff] }
 0x271   : > { %1195 = vmatprep.subr.mxu0 %v2447_v39  ;;  %1851 = vmatprep.subr.mxu1 %v2921_v42 }
 0x272   : > { %1196 = vmatpush1.msra.mxu0 %v2453_v41  ;;  %1852 = vmatpush3.msra.mxu1 %v2922_v48  ;;  %v1343_v48 = vld [vmem:[#allocation7] sm:$0xff] }
 0x273   : > { %1197 = vmatprep.subr.mxu0 %v2923_v59  ;;  %1853 = vmatprep.subr.mxu1 %v2921_v42  ;;  %v1340_v59 = vmax.f32 %v2711_v63, 0.0 }
 0x274   : > { %1198 = vmatpush1.msra.mxu0 %v2924_v8  ;;  %1854 = vmatpush3.msra.mxu1 %v2932_v2 }
 0x275   : > { %1199 = vmatprep.subr.mxu0 %v2933_v3  ;;  %1855 = vmatprep.subr.mxu1 %v2921_v42 }
 0x276   : > { %1200 = vmatpush1.msra.mxu0 %v2934_v4  ;;  %1233 = vmatprep.mubr.f32.mxu0 %v2921_v42 }
 0x277   : > { %1856 = vmatpush3.msra.mxu1 %v2935_v6  ;;  %1857 = vmatprep.mubr.msk.f32.mxu1 %vm2170_vm1, %v2921_v42  ;;  %v1344_v42 = vld [vmem:[#allocation7 + $0x8] sm:$0xff] }
 0x278   : > { %1860 = vmatprep.subr.mxu0 %v1358_v7 }
 0x317   : > { %v1064_v9 = vpop.f32.mrf.mxu0  ;;  %v1135_v11 = vpop.f32.mrf.mxu1 }
 0x318   : > { %v1139_v16 = vadd.f32 %v1064_v9, %v2936_v14  ;;  %v1153_v32 = vadd.f32 %v2631_v26, %v1135_v11  ;;  %v2941_v14 = vld [vmem:[#allocation31_spill] sm:$0xff] }
 0x319   : > { %v1824_v18 = vpop.f32.mrf.mxu1  ;;  %v1066_v21 = vpop.f32.mrf.mxu0 }
 0x31a   : > { %v1603_v19 = vmul.f32 -1.442695, %v1139_v16  ;;  %v1146_v24 = vadd.f32 %v1066_v21, %v2937_v22 }
 0x31c   : > { %1993 = vpow2.f32 %v1603_v19  ;;  %v1604_v25 = vmul.f32 -1.442695, %v1146_v24 }
 0x31e   : > { %1995 = vpow2.f32 %v1604_v25 }
 0x329   : > { %v1994_v27 = vpop.eup %1993 }
 0x32a   : > { %v1143_v28 = vadd.f32 1.0, %v1994_v27 }
 0x32b   : > { %v1996_v29 = vpop.eup %1995 }
 0x32c   : > { %1997 = vrcp.f32 %v1143_v28  ;;  %v1150_v30 = vadd.f32 1.0, %v1996_v29 }
 0x32e   : > { %1999 = vrcp.f32 %v1150_v30 }
 0x339   : > { %v1998_v33 = vpop.eup %1997 }
 0x33a   : > { %v1154_v34 = vmul.f32 %v1998_v33, %v1153_v32 }
 0x33b   : > { %v2000_v37 = vpop.eup %1999 }
 0x33c   : > { %v1155_v36 = vadd.f32 %v1154_v34, %v2938_v35  ;;  %v1157_v38 = vsub.f32 1.0, %v2000_v37  ;;  %v1159_v41 = vmul.f32 %v2000_v37, %v2711_v63 }
 0x33e   : > { %2001 = vtanh.f32 %v1155_v36 }
 0x34b   : > { %v2002_v39 = vpop.eup %2001 }
 0x34c   : > { %v1158_v40 = vmul.f32 %v2002_v39, %v1157_v38 }
 0x34e   : > { %v2785_v43 = vadd.f32 %v1159_v41, %v1158_v40 }
 0x350   : > { %1234 = vmatmul.mubr.f32.vlgmr.msra.gmra.mxu0 %v2785_v43  ;;  %1858 = vmatmul.mubr.f32.vlgmr.msra.gmra.mxu1 %v2785_v43  ;;  %v1341_v8 = vmax.f32 %v2785_v43, 0.0 }
 0x351   : > { %1861 = vmatpush3.msra.mxu0 %v1358_v7  ;;  %1892 = vmatprep.mubr.f32.mxu0 %v1339_v46 }
 0x352   : > { %1862 = vmatprep.subr.mxu0 %v1357_v45 }
 0x353   : > { %1863 = vmatpush3.msra.mxu0 %v1357_v45 }
 0x354   : > { %1864 = vmatprep.subr.mxu0 %v1356_v49 }
 0x355   : > { %1865 = vmatpush3.msra.mxu0 %v1356_v49 }
 0x356   : > { %1866 = vmatprep.subr.mxu0 %v1355_v50 }
 0x357   : > { %1867 = vmatpush3.msra.mxu0 %v1355_v50 }
 0x358   : > { %1868 = vmatprep.subr.mxu0 %v1354_v51 }
 0x359   : > { %1869 = vmatpush3.msra.mxu0 %v1354_v51 }
 0x35a   : > { %1870 = vmatprep.subr.mxu0 %v1353_v52 }
 0x35b   : > { %1871 = vmatpush3.msra.mxu0 %v1353_v52 }
 0x35c   : > { %1872 = vmatprep.subr.mxu0 %v1352_v53 }
 0x35d   : > { %1873 = vmatpush3.msra.mxu0 %v1352_v53 }
 0x35e   : > { %1874 = vmatprep.subr.mxu0 %v1351_v54 }
 0x35f   : > { %1875 = vmatpush3.msra.mxu0 %v1351_v54 }
 0x360   : > { %1876 = vmatprep.subr.mxu0 %v1350_v55 }
 0x361   : > { %1877 = vmatpush3.msra.mxu0 %v1350_v55 }
 0x362   : > { %1878 = vmatprep.subr.mxu0 %v1349_v56 }
 0x363   : > { %1879 = vmatpush3.msra.mxu0 %v1349_v56 }
 0x364   : > { %1880 = vmatprep.subr.mxu0 %v1348_v57 }
 0x365   : > { %1881 = vmatpush3.msra.mxu0 %v1348_v57 }
 0x366   : > { %1882 = vmatprep.subr.mxu0 %v1347_v60 }
 0x367   : > { %1883 = vmatpush3.msra.mxu0 %v1347_v60 }
 0x368   : > { %1884 = vmatprep.subr.mxu0 %v1346_v15 }
 0x369   : > { %1885 = vmatpush3.msra.mxu0 %v1346_v15 }
 0x36a   : > { %1886 = vmatprep.subr.mxu0 %v1345_v10 }
 0x36b   : > { %1887 = vmatpush3.msra.mxu0 %v1345_v10 }
 0x36c   : > { %1888 = vmatprep.subr.mxu0 %v1344_v42 }
 0x36d   : > { %1889 = vmatpush3.msra.mxu0 %v1344_v42 }
 0x36e   : > { %1890 = vmatprep.subr.mxu0 %v1343_v48 }
 0x36f   : > { %1891 = vmatpush3.msra.mxu0 %v1343_v48 }
 0x370   : > { %1893 = vmatmul.mubr.f32.vlgmr.msra.gmra.mxu0 %v1340_v59 }
 0x371   : > { %1895 = vmatprep.mubr.f32.mxu0 %v1341_v8 }
 0x410   : > { %v1235_v13 = vpop.f32.mrf.mxu0  ;;  %v1306_v20 = vpop.f32.mrf.mxu1 }
 0x411   : > { %v1310_v12 = vadd.f32 %v1235_v13, %v2939_v5  ;;  %v1324_v3 = vadd.f32 %v2631_v26, %v1306_v20 }
 0x412   : > { %v1859_v31 = vpop.f32.mrf.mxu1  ;;  %v1237_v61 = vpop.f32.mrf.mxu0 }
 0x413   : > { %v1605_v44 = vmul.f32 -1.442695, %v1310_v12  ;;  %v1317_v23 = vadd.f32 %v1237_v61, %v2940_v17 }
 0x415   : > { %2003 = vpow2.f32 %v1605_v44  ;;  %v1606_v62 = vmul.f32 -1.442695, %v1317_v23 }
 0x417   : > { %2005 = vpow2.f32 %v1606_v62 }
 0x422   : > { %v2004_v1 = vpop.eup %2003 }
 0x423   : > { %v1314_v47 = vadd.f32 1.0, %v2004_v1 }
 0x424   : > { %v2006_v0 = vpop.eup %2005 }
 0x425   : > { %2007 = vrcp.f32 %v1314_v47  ;;  %v1321_v63 = vadd.f32 1.0, %v2006_v0 }
 0x427   : > { %2009 = vrcp.f32 %v1321_v63 }
 0x430   : > { %v1894_v2 = vpop.f32.mrf.mxu0 }
 0x431   : > { %v1438_v4 = vadd.f32 %v1894_v2, %v1607_v58 }
 0x432   : > { %v2008_v6 = vpop.eup %2007  ;;  %v1432_v7 = vpop.f32.mrf.mxu0 }
 0x433   : > { %v1325_v9 = vmul.f32 %v2008_v6, %v1324_v3  ;;  %1452 = vst [vmem:[%s2326_s14 + $0x8] sm:$0xff] %v1438_v4  ;;  %v1433_v11 = vadd.f32 %v1607_v58, %v1432_v7 }
 0x434   : > { %v2010_v18 = vpop.eup %2009 }
 0x435   : > { %v1326_v16 = vadd.f32 %v1325_v9, %v2941_v14  ;;  %1451 = vst [vmem:[%s2326_s14] sm:$0xff] %v1433_v11  ;;  %v1328_v19 = vsub.f32 1.0, %v2010_v18  ;;  %v1330_v24 = vmul.f32 %v2010_v18, %v2785_v43 }
 0x437   : > { %2011 = vtanh.f32 %v1326_v16 }
 0x444   : > { %v2012_v21 = vpop.eup %2011 }
 0x445   : > { %v1329_v22 = vmul.f32 %v2012_v21, %v1328_v19 }
 0x447   : > { %v1331_v25 = vadd.f32 %v1330_v24, %v1329_v22 }
 0x449   : > { %v1342_v26 = vmax.f32 %v1331_v25, 0.0  ;;  %1334 = vst [vmem:[#allocation10] sm:$0xff] %v1331_v25 }
 0x44b   : > { %1896 = vmatmul.mubr.f32.gmra.mxu0 %v1342_v26 }
 0x44c   : > { %2078 = shalt.err (!%p2075_p4)
}
 0x44d   : > { %p2943_p9 = pmov %p2942_p8  ;;  %s1615_s29 = sshll.u32 %s2246_s13, 9 }
 0x44e   : > { %s1469_s27 = sshll.u32 %s2326_s14, 4  ;;  %s2814_s24 = scalar_lea.hbm %s2874_s8, %s1615_s29  ;;  %s2816_s27 = int_to_ptr.vmem [resolvable:$true] %s1469_s27 }
 0x44f   : > { %1908 = dma.vmem_to_hbm [thread:$0]  (%p2943_p9), %s1484_s16, 128, %s2875_s9, [#allocation11]  }
 0x450   : > { %s2822_s26 = scalar_lea.sflag [#allocation6], %s351_s18  ;;  %s2089_s28 = scalar_lea.vmem %s2816_s27, 512 }
 0x451   : > { %p2090_p6 = scmp.ne.s32.totalorder %s2816_s27, %s2089_s28  ;;  %s2172_s16 = smov [#allocation9]  }
 0x452   : > { %s2093_s17 = sshll.u32 %s2172_s16, 4  ;;  %s2094_s17 = int_to_ptr.vmem [resolvable:$false] %s2093_s17 }
 0x453   : > { %p2091_p10 = pnand %p2090_p6, %p2265_p5  ;;  %s2095_s22 = scalar_lea.vmem %s2094_s17, 1024 }
 0x454   : > { %p2096_p13 = scmp.lt.s32.totalorder %s2816_s27, %s2094_s17  ;;  %p2097_p0 = scmp.lt.s32.totalorder %s2095_s22, %s2089_s28 }
 0x455   : > { %p2092_p11 = pneg %p2091_p10 }
 0x456   : > { %p2098_p8 = por %p2097_p0, %p2096_p13 }
 0x458   : > { %p2099_p12 = pnand %p2098_p8, %p2092_p11 }
 0x50b   : > { %v1897_v27 = vpop.f32.mrf.mxu0 }
 0x50c   : > { %v1448_v28 = vadd.f32 %v1897_v27, %v1607_v58 }
 0x50d   : > { %v1442_v29 = vpop.f32.mrf.mxu0 }
 0x50e   : > { %1454 = vst [vmem:[%s2326_s14 + $0x18] sm:$0xff] %v1448_v28  ;;  %v1443_v30 = vadd.f32 %v1607_v58, %v1442_v29 }
 0x510   : > { %1453 = vst [vmem:[%s2326_s14 + $0x10] sm:$0xff] %v1443_v30 }
 0x511   : > { %2102 = shalt.err (!%p2099_p12)
}
 0x512   : > { %s2103_s18 = scalar_lea.hbm %s2814_s24, 512  ;;  %s2107_s29 = scalar_lea.hbm %s2874_s8, 1024 }
 0x513   : > { %p2104_p1 = scmp.ne.s32.totalorder %s2814_s24, %s2103_s18  ;;  %p2108_p2 = scmp.lt.s32.totalorder %s2814_s24, %s2874_s8 }
 0x514   : > { %p2109_p4 = scmp.lt.s32.totalorder %s2107_s29, %s2103_s18 }
 0x515   : > { %p2105_p3 = pnand %p2104_p1, %p2265_p5 }
 0x516   : > { %p2110_p9 = por %p2109_p4, %p2108_p2 }
 0x517   : > { %p2106_p7 = pneg %p2105_p3 }
 0x519   : > { %p2111_p6 = pnand %p2110_p9, %p2106_p7 }
 0x51b   : > { %2114 = shalt.err (!%p2111_p6)
}
 0x51c   : > { %s2173_s28 = smov 128   ;;  %s2174_s16 = smov 8  }
 0x51d   : > { %1906 = dma.vmem_to_hbm [thread:$0]  (%p2265_p5), %s2816_s27, 512, %s2814_s24, %s2822_s26, %s2173_s28, %s2173_s28, %s2174_s16  }
 0x51e   : > { %p2944_p10 = scmp.eq.s32.totalorder %s2246_s13, 1 }
 0x520   : > { %2140 = dma.done.wait (%p2944_p10), [#allocation11], 128   ;;  %p2945_p11 = pmov %p2944_p10 }
 0x522   : > { %2142 = vsyncadd (%p2945_p11), [#allocation11], 4294967168 }
 0x523 PF: > { %p1929_p13 = scmp.ge.s32.totalorder %s2161_s12, 2  ;;  %s1499_s17 = sand.u32 1, %s2149_s30  }
 0x524   : > { %p2946_p0 = scmp.ne.s32.totalorder %s2897_s20, 0  ;;  %s1500_s22 = scalar_lea.sflag [#allocation6], %s1499_s17 }
 0x526   : > { %p1920_p8 = pnand %p1929_p13, %p2946_p0 }
 0x528   : > { %p1921_p12 = pneg %p1920_p8 }
 0x52a   : > { %2144 = dma.done.wait (%p1921_p12), %s1500_s22, 512  }
 0x52b   : > { %2146 = vsyncadd (%p1921_p12), %s1500_s22, 4294966784  ;;  %s2947_s19 = sld [smem:[#allocation16_spill]]  ;;  %p23_p5 = scmp.ge.s32.totalorder %s2250_s15, 4  }
 0x52c   : > { %s2948_s30 = smov %s2153_s10  ;;  %s2949_s10 = smov %s2157_s11 }
 0x52d   : > { %s2951_s12 = smov %s2250_s15  ;;  %25 = sbr.rel (!%p23_p5) target bundleno = 6 (0x6), region = 115 }
 0x531   : > { %s2950_s11 = smov %s2947_s19 }
 0x532   :  { %1505 = vsyncpa [#allocation5], 1 }
 0x533   :  { %1507 = vsyncpa [#allocation5 + $0x1], 1 }
 0x534   :  { %1508 = vsyncpa [#allocation8], 1 }
 0x535   :  { %1509 = vsyncpa [#allocation6], 1 }
 0x536   :  { %1511 = vsyncpa [#allocation6 + $0x1], 1 }
 0x537   :  { %1512 = vsyncpa [#allocation11], 1 }

</bundles_post_ra>
